<compile_context>
chip_gen: v5e
topology: v5e:2x2
jax: 0.10.0
libtpu: 0.0.40
codegen_flags: <defaults>
</compile_context>

<pallas_src>
import functools

import jax
import jax.numpy as jnp
from jax.experimental import pallas as pl
from jax.experimental.pallas import tpu as pltpu


# ----------------------------- activations ----------------------------------
def _hardswish(x):
    return x * jnp.clip(x + 3.0, 0.0, 6.0) * (1.0 / 6.0)


def _hardsigmoid(x):
    return jnp.clip(x + 3.0, 0.0, 6.0) * (1.0 / 6.0)


# ------------------------------ Pallas kernel --------------------------------
def _inverted_residual_kernel(
    x_ref,        # (BN, H, W*Cin)   lane-dense NHWC slab (io dtype)
    w_exp_ref,    # (W*Cin, W*Cexp)  block-diag 1x1 expand (BN folded, mxu dtype)
    b_exp_ref,    # (1, W*Cexp)      f32
    w_dw_ref,     # (9, W*Cexp)      depthwise taps, lane-tiled over W, f32
    b_dw_ref,     # (1, W*Cexp)      f32
    s_pool_ref,   # (W*Cexp, Cexp)   per-channel lane-group sum, 1/(H*W) folded
    w_fc1_ref,    # (Cexp, Csq)      SE fc1, f32
    b_fc1_ref,    # (1, Csq)
    w_fc2_ref,    # (Csq, Cexp)      SE fc2, f32
    b_fc2_ref,    # (1, Cexp)
    s_bcast_ref,  # (Cexp, W*Cexp)   replicate per-channel SE scale to lanes
    w_proj_ref,   # (W*Cexp, W*Cout) block-diag 1x1 project (BN folded, mxu dtype)
    b_proj_ref,   # (1, W*Cout)      f32
    out_ref,      # (BN, H, W*Cout)  io dtype
    *, bn, hdim, wdim, cin, cexp, cout, use_res,
):
    f32 = jnp.float32
    rows = bn * hdim
    lw_e = wdim * cexp

    # ---- lane-dense input: rows = (n, h), lanes = (w, c) ----
    x_in = x_ref[...].reshape(rows, wdim * cin)          # io dtype, lane dim kept

    # ---- 1x1 expand conv (+ folded BN) + hardswish (MXU, f32 accumulation) ----
    hexp = jnp.dot(x_in.astype(w_exp_ref.dtype), w_exp_ref[...],
                   preferred_element_type=f32) + b_exp_ref[...]
    hexp = _hardswish(hexp)                              # (rows, W*Cexp) f32

    # ---- depthwise 3x3, stride 1, pad 1 ----
    # W taps: lane rotations by +-Cexp (XLU) + lane edge masks.
    # H taps: sublane rotations by +-1 row (XLU) + per-sample h==0/h==H-1 masks.
    lane = jax.lax.broadcasted_iota(jnp.int32, (rows, lw_e), 1)
    hrow = jax.lax.broadcasted_iota(jnp.int32, (rows, lw_e), 0) % hdim
    w_ok_m1 = lane >= cexp                # w-1 in range
    w_ok_p1 = lane < lw_e - cexp          # w+1 in range
    h_ok_m1 = hrow > 0                    # h-1 in range (row-1 is same sample)
    h_ok_p1 = hrow < hdim - 1             # h+1 in range

    h_wm1 = jnp.where(w_ok_m1, pltpu.roll(hexp, shift=cexp, axis=1), 0.0)        # w-1
    h_wp1 = jnp.where(w_ok_p1, pltpu.roll(hexp, shift=lw_e - cexp, axis=1), 0.0)  # w+1

    wdw = w_dw_ref[...]                                  # (9, W*Cexp)

    def _w_combined(kh):                 # sum over kw of tap * weight, one kh row
        return (h_wm1 * wdw[3 * kh + 0:3 * kh + 1, :]
                + hexp * wdw[3 * kh + 1:3 * kh + 2, :]
                + h_wp1 * wdw[3 * kh + 2:3 * kh + 3, :])

    # out(h) = g0(h-1) + g1(h) + g2(h+1); rolls are sublane rotations over rows.
    acc = jnp.where(h_ok_m1, pltpu.roll(_w_combined(0), shift=1, axis=0), 0.0)
    acc = acc + _w_combined(1)
    acc = acc + jnp.where(h_ok_p1,
                          pltpu.roll(_w_combined(2), shift=rows - 1, axis=0), 0.0)
    hdw = _hardswish(acc + b_dw_ref[...])                # (rows, W*Cexp) f32

    # ---- squeeze-excitation ----
    # H pooling: reshape + axis-1 sum (no O(bn^2) constant matrices);
    # W/lane pooling + broadcast via small fixed-size constant matmuls.
    hdw3 = hdw.reshape(bn, hdim, lw_e)
    pool = jnp.dot(jnp.sum(hdw3, axis=1), s_pool_ref[...],
                   preferred_element_type=f32)                        # (bn, Cexp)
    s = jnp.maximum(jnp.dot(pool, w_fc1_ref[...],
                            preferred_element_type=f32) + b_fc1_ref[...], 0.0)
    s = _hardsigmoid(jnp.dot(s, w_fc2_ref[...],
                             preferred_element_type=f32) + b_fc2_ref[...])
    s_lanes = jnp.dot(s, s_bcast_ref[...], preferred_element_type=f32)  # (bn, W*Cexp)
    hse = (hdw3 * s_lanes[:, None, :]).reshape(rows, lw_e)

    # ---- 1x1 project conv (+ folded BN, Identity activation) ----
    y = jnp.dot(hse.astype(w_proj_ref.dtype), w_proj_ref[...],
                preferred_element_type=f32) + b_proj_ref[...]          # (rows, W*Cout)

    # ---- residual connection (stride==1 and Cin==Cout), f32 ----
    if use_res:
        y = y + x_in.astype(f32)

    out_ref[...] = y.reshape(bn, hdim, wdim * cout).astype(out_ref.dtype)


# ------------------------------ wrapper --------------------------------------
def _pick_block_n(n, h, target_rows=512):
    """Largest divisor of n with block_n*h <= target_rows; keep >=2 grid steps
    when the batch allows it so v7x can shard the batch axis over its 2 TCs."""
    cap = max(1, target_rows // max(h, 1))
    if n >= 2:
        cap = min(cap, max(1, n // 2))
    best = 1
    for d in range(1, min(cap, n) + 1):
        if n % d == 0:
            best = d
    return best


def inverted_residual(x_nchw, params, *, block_n=None,
                      mxu_dtype=jnp.bfloat16, io_dtype=jnp.bfloat16):
    """x_nchw: (N, Cin, H, W) float32; returns (N, Cout, H, W) float32."""
    N, Cin, H, W = x_nchw.shape
    Cexp = params["w_exp"].shape[1]
    Csq = params["w_fc1"].shape[1]
    Cout = params["w_proj"].shape[1]
    use_res = (Cin == Cout)              # stride == 1 in this config
    if block_n is None:
        block_n = _pick_block_n(N, H)
    assert N % block_n == 0

    lw_i, lw_e, lw_o = W * Cin, W * Cexp, W * Cout

    # Lane-dense NHWC slab (N, H, W*Cin); reshape is free on contiguous NHWC.
    x_l = jnp.transpose(x_nchw, (0, 2, 3, 1)).reshape(N, H, lw_i).astype(io_dtype)

    # --- constant layout / structure matrices built once on the host ---
    eye_w = jnp.eye(W, dtype=jnp.float32)
    eye_e = jnp.eye(Cexp, dtype=jnp.float32)

    def _block_diag(m):                  # (a, b) -> (W*a, W*b), W diag copies
        a, b = m.shape
        return jnp.einsum("xy,ab->xayb", eye_w, m).reshape(W * a, W * b)

    w_exp_bd = _block_diag(params["w_exp"]).astype(mxu_dtype)
    w_proj_bd = _block_diag(params["w_proj"]).astype(mxu_dtype)
    b_exp_l = jnp.tile(params["b_exp"], (1, W))
    w_dw_l = jnp.tile(params["w_dw"], (1, W))
    b_dw_l = jnp.tile(params["b_dw"], (1, W))
    b_proj_l = jnp.tile(params["b_proj"], (1, W))
    s_pool = jnp.tile(eye_e, (W, 1)) / float(H * W)   # lane-group sum, mean folded
    s_bcast = jnp.tile(eye_e, (1, W))                 # channel scale -> all W lanes

    param_list = [
        w_exp_bd, b_exp_l, w_dw_l, b_dw_l,
        s_pool,
        params["w_fc1"], params["b_fc1"], params["w_fc2"], params["b_fc2"],
        s_bcast,
        w_proj_bd, b_proj_l,
    ]
    # Constant index maps: parameter blocks stay resident across grid steps.
    param_specs = [pl.BlockSpec(p.shape, lambda n: (0, 0)) for p in param_list]

    flops = int(
        2 * N * H * W * (Cin * Cexp + Cexp * Cout)      # 1x1 expand + project
        + 18 * N * H * W * Cexp                         # depthwise 3x3
        + 2 * N * (2 * Cexp * Csq + H * W * Cexp))      # SE
    bytes_accessed = int(
        x_l.size * x_l.dtype.itemsize
        + N * H * lw_o * jnp.dtype(io_dtype).itemsize
        + sum(int(p.size) * p.dtype.itemsize for p in param_list))

    kernel = functools.partial(
        _inverted_residual_kernel,
        bn=block_n, hdim=H, wdim=W, cin=Cin, cexp=Cexp, cout=Cout, use_res=use_res)

    out_l = pl.pallas_call(
        kernel,
        out_shape=jax.ShapeDtypeStruct((N, H, lw_o), io_dtype),
        grid_spec=pltpu.PrefetchScalarGridSpec(
            num_scalar_prefetch=0,
            grid=(N // block_n,),
            in_specs=[pl.BlockSpec((block_n, H, lw_i), lambda n: (n, 0, 0))]
            + param_specs,
            out_specs=pl.BlockSpec((block_n, H, lw_o), lambda n: (n, 0, 0)),
        ),
        compiler_params=pltpu.CompilerParams(
            dimension_semantics=("parallel",),
            vmem_limit_bytes=32 * 1024 * 1024),
        cost_estimate=pl.CostEstimate(
            flops=flops, transcendentals=0, bytes_accessed=bytes_accessed),
    )(x_l, *param_list)

    return jnp.transpose(out_l.reshape(N, H, W, Cout), (0, 3, 1, 2)).astype(jnp.float32)


# -------------------------- parameter construction ---------------------------
def _fold_bn(w, gamma, beta, mean, var, eps=1e-5):
    """Fold eval-mode BatchNorm into a conv expressed as (..., Cout) matrix."""
    scale = gamma / jnp.sqrt(var + eps)
    return w * scale[None, :], (beta - mean * scale)[None, :]


def make_params(key, cin=16, cexp=64, csq=16, cout=16, k=3):
    keys = jax.random.split(key, 16)
    nrm = lambda kk, shape, s=0.1: s * jax.random.normal(kk, shape, jnp.float32)

    w_exp_raw = nrm(keys[0], (cin, cexp))
    w_dw_raw = nrm(keys[1], (k * k, cexp))
    w_proj_raw = nrm(keys[2], (cexp, cout))
    w_fc1 = nrm(keys[3], (cexp, csq))
    b_fc1 = nrm(keys[4], (csq,))[None, :]
    w_fc2 = nrm(keys[5], (csq, cexp))
    b_fc2 = nrm(keys[6], (cexp,))[None, :]

    def bn(kk, c):
        k1, k2, k3, k4 = jax.random.split(kk, 4)
        gamma = 1.0 + 0.1 * jax.random.normal(k1, (c,), jnp.float32)
        beta = 0.1 * jax.random.normal(k2, (c,), jnp.float32)
        mean = 0.1 * jax.random.normal(k3, (c,), jnp.float32)
        var = jnp.abs(jax.random.normal(k4, (c,), jnp.float32)) + 0.5
        return gamma, beta, mean, var

    w_exp, b_exp = _fold_bn(w_exp_raw, *bn(keys[7], cexp))
    w_dw, b_dw = _fold_bn(w_dw_raw, *bn(keys[8], cexp))
    w_proj, b_proj = _fold_bn(w_proj_raw, *bn(keys[9], cout))

    return dict(
        w_exp=w_exp, b_exp=b_exp,
        w_dw=w_dw, b_dw=b_dw,
        w_fc1=w_fc1, b_fc1=b_fc1,
        w_fc2=w_fc2, b_fc2=b_fc2,
        w_proj=w_proj, b_proj=b_proj,
    )


# --------------------------- pure-JAX reference -------------------------------
def inverted_residual_ref(x_nchw, p):
    x = jnp.transpose(x_nchw, (0, 2, 3, 1)).astype(jnp.float32)       # NHWC
    N, H, W, Cin = x.shape
    h = _hardswish(jnp.einsum("nhwc,cd->nhwd", x, p["w_exp"]) + p["b_exp"][0])
    xp = jnp.pad(h, ((0, 0), (1, 1), (1, 1), (0, 0)))
    acc = jnp.zeros_like(h)
    for kh in range(3):
        for kw in range(3):
            acc = acc + xp[:, kh:kh + H, kw:kw + W, :] * p["w_dw"][kh * 3 + kw]
    h = _hardswish(acc + p["b_dw"][0])
    pool = jnp.mean(h, axis=(1, 2))                                   # (N, Cexp)
    s = jnp.maximum(pool @ p["w_fc1"] + p["b_fc1"][0], 0.0)
    s = _hardsigmoid(s @ p["w_fc2"] + p["b_fc2"][0])
    h = h * s[:, None, None, :]
    y = jnp.einsum("nhwc,cd->nhwd", h, p["w_proj"]) + p["b_proj"][0]
    y = y + x                                                          # residual
    return jnp.transpose(y, (0, 3, 1, 2))


# ----------------------------------- main ------------------------------------
if __name__ == "__main__":
    key = jax.random.PRNGKey(0)
    kx, kp = jax.random.split(key)

    N, Cin, H, W = 2, 16, 8, 8
    x = jax.random.normal(kx, (N, Cin, H, W), jnp.float32)
    params = make_params(kp, cin=Cin, cexp=64, csq=16, cout=Cin, k=3)

    ref = jax.block_until_ready(inverted_residual_ref(x, params))

    # Strict path: f32 I/O + f32 MXU operands (bit-accurate on all TPU gens).
    out_f32 = jax.block_until_ready(
        inverted_residual(x, params, mxu_dtype=jnp.float32, io_dtype=jnp.float32))
    assert out_f32.shape == (N, Cin, H, W)
    assert jnp.allclose(out_f32, ref, atol=1e-4, rtol=1e-4), "f32 mismatch vs reference"

    # Default fast path: bf16 I/O slabs + bf16 MXU operands, f32 accumulation/SE/residual.
    out_fast = jax.block_until_ready(inverted_residual(x, params))
    assert out_fast.shape == (N, Cin, H, W)
    assert jnp.allclose(out_fast, ref, atol=1e-1, rtol=1e-1), "bf16 mismatch vs reference"

    print("KERNEL_OK")
</pallas_src>

<mosaic_0001>
module attributes {stable_mosaic.version = 11 : i64} {
  func.func @_inverted_residual_kernel(%arg0: i32, %arg1: memref<1x8x128xf32, #tpu.memory_space<vmem>>, %arg2: memref<128x512xf32, #tpu.memory_space<vmem>>, %arg3: memref<1x512xf32, #tpu.memory_space<vmem>>, %arg4: memref<9x512xf32, #tpu.memory_space<vmem>>, %arg5: memref<1x512xf32, #tpu.memory_space<vmem>>, %arg6: memref<512x64xf32, #tpu.memory_space<vmem>>, %arg7: memref<64x16xf32, #tpu.memory_space<vmem>>, %arg8: memref<1x16xf32, #tpu.memory_space<vmem>>, %arg9: memref<16x64xf32, #tpu.memory_space<vmem>>, %arg10: memref<1x64xf32, #tpu.memory_space<vmem>>, %arg11: memref<64x512xf32, #tpu.memory_space<vmem>>, %arg12: memref<512x128xf32, #tpu.memory_space<vmem>>, %arg13: memref<1x128xf32, #tpu.memory_space<vmem>>, %arg14: memref<1x8x128xf32, #tpu.memory_space<vmem>>) attributes {dimension_semantics = [#tpu.dimension_semantics<parallel>], iteration_bounds = array<i64: 2>, scalar_prefetch = 0 : i64, scratch_operands = 0 : i64, tpu.core_type = #tpu.core_type<tc>, window_params = [{transform_indices = @transform_0, window_bounds = array<i64: 1, 8, 128>}, {pipeline_mode = #tpu.pipeline_mode<synchronous>, transform_indices = @transform_1, window_bounds = array<i64: 128, 512>}, {pipeline_mode = #tpu.pipeline_mode<synchronous>, transform_indices = @transform_2, window_bounds = array<i64: 1, 512>}, {pipeline_mode = #tpu.pipeline_mode<synchronous>, transform_indices = @transform_3, window_bounds = array<i64: 9, 512>}, {pipeline_mode = #tpu.pipeline_mode<synchronous>, transform_indices = @transform_4, window_bounds = array<i64: 1, 512>}, {pipeline_mode = #tpu.pipeline_mode<synchronous>, transform_indices = @transform_5, window_bounds = array<i64: 512, 64>}, {pipeline_mode = #tpu.pipeline_mode<synchronous>, transform_indices = @transform_6, window_bounds = array<i64: 64, 16>}, {pipeline_mode = #tpu.pipeline_mode<synchronous>, transform_indices = @transform_7, window_bounds = array<i64: 1, 16>}, {pipeline_mode = #tpu.pipeline_mode<synchronous>, transform_indices = @transform_8, window_bounds = array<i64: 16, 64>}, {pipeline_mode = #tpu.pipeline_mode<synchronous>, transform_indices = @transform_9, window_bounds = array<i64: 1, 64>}, {pipeline_mode = #tpu.pipeline_mode<synchronous>, transform_indices = @transform_10, window_bounds = array<i64: 64, 512>}, {pipeline_mode = #tpu.pipeline_mode<synchronous>, transform_indices = @transform_11, window_bounds = array<i64: 512, 128>}, {pipeline_mode = #tpu.pipeline_mode<synchronous>, transform_indices = @transform_12, window_bounds = array<i64: 1, 128>}, {transform_indices = @transform_13, window_bounds = array<i64: 1, 8, 128>}]} {
    %c0 = arith.constant 0 : index
    %c0_0 = arith.constant 0 : index
    %c0_1 = arith.constant 0 : index
    %0 = vector.load %arg1[%c0, %c0_0, %c0_1] : memref<1x8x128xf32, #tpu.memory_space<vmem>>, vector<1x8x128xf32>
    %1 = vector.shape_cast %0 : vector<1x8x128xf32> to vector<8x128xf32>
    %c0_2 = arith.constant 0 : index
    %c0_3 = arith.constant 0 : index
    %2 = vector.load %arg2[%c0_2, %c0_3] : memref<128x512xf32, #tpu.memory_space<vmem>>, vector<128x512xf32>
    %cst = arith.constant dense<0.000000e+00> : vector<8x512xf32>
    %3 = tpu.matmul %1, %2, %cst {dimension_numbers = #tpu.dot_dimension_numbers<[1], [0], [0], [1], [0, 0, 1, 1], [], []>} : vector<8x128xf32>, vector<128x512xf32>, vector<8x512xf32> -> vector<8x512xf32>
    %c0_4 = arith.constant 0 : index
    %c0_5 = arith.constant 0 : index
    %4 = vector.load %arg3[%c0_4, %c0_5] : memref<1x512xf32, #tpu.memory_space<vmem>>, vector<1x512xf32>
    %5 = vector.broadcast %4 : vector<1x512xf32> to vector<8x512xf32>
    %6 = arith.addf %3, %5 : vector<8x512xf32>
    %cst_6 = arith.constant 3.000000e+00 : f32
    %7 = vector.broadcast %cst_6 : f32 to vector<8x512xf32>
    %8 = arith.addf %6, %7 : vector<8x512xf32>
    %cst_7 = arith.constant 0.000000e+00 : f32
    %cst_8 = arith.constant 6.000000e+00 : f32
    %9 = vector.broadcast %cst_7 : f32 to vector<8x512xf32>
    %10 = arith.maximumf %9, %8 : vector<8x512xf32>
    %11 = vector.broadcast %cst_8 : f32 to vector<8x512xf32>
    %12 = arith.minimumf %11, %10 : vector<8x512xf32>
    %13 = arith.mulf %6, %12 : vector<8x512xf32>
    %cst_9 = arith.constant 0.166666672 : f32
    %14 = vector.broadcast %cst_9 : f32 to vector<8x512xf32>
    %15 = arith.mulf %13, %14 : vector<8x512xf32>
    %16 = tpu.iota {dimensions = array<i32: 1>} : vector<8x512xi32>
    %17 = tpu.iota {dimensions = array<i32: 0>} : vector<8x512xi32>
    %c8_i32 = arith.constant 8 : i32
    %c0_i32 = arith.constant 0 : i32
    %18 = arith.cmpi eq, %c8_i32, %c0_i32 : i32
    %c1_i32 = arith.constant 1 : i32
    %19 = arith.select %18, %c1_i32, %c8_i32 : i32
    %20 = vector.broadcast %19 : i32 to vector<8x512xi32>
    %21 = arith.remsi %17, %20 : vector<8x512xi32>
    %c0_i32_10 = arith.constant 0 : i32
    %22 = vector.broadcast %c0_i32_10 : i32 to vector<8x512xi32>
    %23 = arith.cmpi ne, %21, %22 : vector<8x512xi32>
    %c0_i32_11 = arith.constant 0 : i32
    %24 = vector.broadcast %c0_i32_11 : i32 to vector<8x512xi32>
    %25 = arith.cmpi slt, %21, %24 : vector<8x512xi32>
    %c0_i32_12 = arith.constant 0 : i32
    %26 = arith.cmpi slt, %19, %c0_i32_12 : i32
    %27 = vector.broadcast %26 : i1 to vector<8x512xi1>
    %28 = vector.broadcast %27 : vector<8x512xi1> to vector<8x512xi1>
    %29 = arith.xori %25, %28 : vector<8x512xi1>
    %30 = arith.andi %29, %23 : vector<8x512xi1>
    %31 = vector.broadcast %19 : i32 to vector<8x512xi32>
    %32 = arith.addi %21, %31 : vector<8x512xi32>
    %33 = arith.select %30, %32, %21 : vector<8x512xi1>, vector<8x512xi32>
    %c64_i32 = arith.constant 64 : i32
    %34 = vector.broadcast %c64_i32 : i32 to vector<8x512xi32>
    %35 = arith.cmpi sge, %16, %34 : vector<8x512xi32>
    %c448_i32 = arith.constant 448 : i32
    %36 = vector.broadcast %c448_i32 : i32 to vector<8x512xi32>
    %37 = arith.cmpi slt, %16, %36 : vector<8x512xi32>
    %c0_i32_13 = arith.constant 0 : i32
    %38 = vector.broadcast %c0_i32_13 : i32 to vector<8x512xi32>
    %39 = arith.cmpi sgt, %33, %38 : vector<8x512xi32>
    %c7_i32 = arith.constant 7 : i32
    %40 = vector.broadcast %c7_i32 : i32 to vector<8x512xi32>
    %41 = arith.cmpi slt, %33, %40 : vector<8x512xi32>
    %c64_i32_14 = arith.constant 64 : i32
    %42 = tpu.dynamic_rotate %15 by %c64_i32_14 dim 1 : vector<8x512xf32>, i32 -> vector<8x512xf32>
    %cst_15 = arith.constant 0.000000e+00 : f32
    %43 = vector.broadcast %cst_15 : f32 to vector<8x512xf32>
    %44 = arith.select %35, %42, %43 : vector<8x512xi1>, vector<8x512xf32>
    %c448_i32_16 = arith.constant 448 : i32
    %45 = tpu.dynamic_rotate %15 by %c448_i32_16 dim 1 : vector<8x512xf32>, i32 -> vector<8x512xf32>
    %cst_17 = arith.constant 0.000000e+00 : f32
    %46 = vector.broadcast %cst_17 : f32 to vector<8x512xf32>
    %47 = arith.select %37, %45, %46 : vector<8x512xi1>, vector<8x512xf32>
    %c0_18 = arith.constant 0 : index
    %c0_19 = arith.constant 0 : index
    %48 = vector.load %arg4[%c0_18, %c0_19] : memref<9x512xf32, #tpu.memory_space<vmem>>, vector<9x512xf32>
    %49 = vector.extract_strided_slice %48 {offsets = [0, 0], sizes = [1, 512], strides = [1, 1]} : vector<9x512xf32> to vector<1x512xf32>
    %50 = vector.broadcast %49 : vector<1x512xf32> to vector<8x512xf32>
    %51 = arith.mulf %44, %50 : vector<8x512xf32>
    %52 = vector.extract_strided_slice %48 {offsets = [1, 0], sizes = [1, 512], strides = [1, 1]} : vector<9x512xf32> to vector<1x512xf32>
    %53 = vector.broadcast %52 : vector<1x512xf32> to vector<8x512xf32>
    %54 = arith.mulf %15, %53 : vector<8x512xf32>
    %55 = arith.addf %51, %54 : vector<8x512xf32>
    %56 = vector.extract_strided_slice %48 {offsets = [2, 0], sizes = [1, 512], strides = [1, 1]} : vector<9x512xf32> to vector<1x512xf32>
    %57 = vector.broadcast %56 : vector<1x512xf32> to vector<8x512xf32>
    %58 = arith.mulf %47, %57 : vector<8x512xf32>
    %59 = arith.addf %55, %58 : vector<8x512xf32>
    %c1_i32_20 = arith.constant 1 : i32
    %60 = tpu.dynamic_rotate %59 by %c1_i32_20 dim 0 : vector<8x512xf32>, i32 -> vector<8x512xf32>
    %cst_21 = arith.constant 0.000000e+00 : f32
    %61 = vector.broadcast %cst_21 : f32 to vector<8x512xf32>
    %62 = arith.select %39, %60, %61 : vector<8x512xi1>, vector<8x512xf32>
    %63 = vector.extract_strided_slice %48 {offsets = [3, 0], sizes = [1, 512], strides = [1, 1]} : vector<9x512xf32> to vector<1x512xf32>
    %64 = vector.broadcast %63 : vector<1x512xf32> to vector<8x512xf32>
    %65 = arith.mulf %44, %64 : vector<8x512xf32>
    %66 = vector.extract_strided_slice %48 {offsets = [4, 0], sizes = [1, 512], strides = [1, 1]} : vector<9x512xf32> to vector<1x512xf32>
    %67 = vector.broadcast %66 : vector<1x512xf32> to vector<8x512xf32>
    %68 = arith.mulf %15, %67 : vector<8x512xf32>
    %69 = arith.addf %65, %68 : vector<8x512xf32>
    %70 = vector.extract_strided_slice %48 {offsets = [5, 0], sizes = [1, 512], strides = [1, 1]} : vector<9x512xf32> to vector<1x512xf32>
    %71 = vector.broadcast %70 : vector<1x512xf32> to vector<8x512xf32>
    %72 = arith.mulf %47, %71 : vector<8x512xf32>
    %73 = arith.addf %69, %72 : vector<8x512xf32>
    %74 = arith.addf %62, %73 : vector<8x512xf32>
    %75 = vector.extract_strided_slice %48 {offsets = [6, 0], sizes = [1, 512], strides = [1, 1]} : vector<9x512xf32> to vector<1x512xf32>
    %76 = vector.broadcast %75 : vector<1x512xf32> to vector<8x512xf32>
    %77 = arith.mulf %44, %76 : vector<8x512xf32>
    %78 = vector.extract_strided_slice %48 {offsets = [7, 0], sizes = [1, 512], strides = [1, 1]} : vector<9x512xf32> to vector<1x512xf32>
    %79 = vector.broadcast %78 : vector<1x512xf32> to vector<8x512xf32>
    %80 = arith.mulf %15, %79 : vector<8x512xf32>
    %81 = arith.addf %77, %80 : vector<8x512xf32>
    %82 = vector.extract_strided_slice %48 {offsets = [8, 0], sizes = [1, 512], strides = [1, 1]} : vector<9x512xf32> to vector<1x512xf32>
    %83 = vector.broadcast %82 : vector<1x512xf32> to vector<8x512xf32>
    %84 = arith.mulf %47, %83 : vector<8x512xf32>
    %85 = arith.addf %81, %84 : vector<8x512xf32>
    %c7_i32_22 = arith.constant 7 : i32
    %86 = tpu.dynamic_rotate %85 by %c7_i32_22 dim 0 : vector<8x512xf32>, i32 -> vector<8x512xf32>
    %cst_23 = arith.constant 0.000000e+00 : f32
    %87 = vector.broadcast %cst_23 : f32 to vector<8x512xf32>
    %88 = arith.select %41, %86, %87 : vector<8x512xi1>, vector<8x512xf32>
    %89 = arith.addf %74, %88 : vector<8x512xf32>
    %c0_24 = arith.constant 0 : index
    %c0_25 = arith.constant 0 : index
    %90 = vector.load %arg5[%c0_24, %c0_25] : memref<1x512xf32, #tpu.memory_space<vmem>>, vector<1x512xf32>
    %91 = vector.broadcast %90 : vector<1x512xf32> to vector<8x512xf32>
    %92 = arith.addf %89, %91 : vector<8x512xf32>
    %cst_26 = arith.constant 3.000000e+00 : f32
    %93 = vector.broadcast %cst_26 : f32 to vector<8x512xf32>
    %94 = arith.addf %92, %93 : vector<8x512xf32>
    %cst_27 = arith.constant 0.000000e+00 : f32
    %cst_28 = arith.constant 6.000000e+00 : f32
    %95 = vector.broadcast %cst_27 : f32 to vector<8x512xf32>
    %96 = arith.maximumf %95, %94 : vector<8x512xf32>
    %97 = vector.broadcast %cst_28 : f32 to vector<8x512xf32>
    %98 = arith.minimumf %97, %96 : vector<8x512xf32>
    %99 = arith.mulf %92, %98 : vector<8x512xf32>
    %cst_29 = arith.constant 0.166666672 : f32
    %100 = vector.broadcast %cst_29 : f32 to vector<8x512xf32>
    %101 = arith.mulf %99, %100 : vector<8x512xf32>
    %102 = vector.shape_cast %101 : vector<8x512xf32> to vector<1x8x512xf32>
    %cst_30 = arith.constant dense<0.000000e+00> : vector<1x512xf32>
    %103 = vector.multi_reduction <add>, %102, %cst_30 [1] : vector<1x8x512xf32> to vector<1x512xf32>
    %c0_31 = arith.constant 0 : index
    %c0_32 = arith.constant 0 : index
    %104 = vector.load %arg6[%c0_31, %c0_32] : memref<512x64xf32, #tpu.memory_space<vmem>>, vector<512x64xf32>
    %cst_33 = arith.constant dense<0.000000e+00> : vector<1x64xf32>
    %105 = tpu.matmul %103, %104, %cst_33 {dimension_numbers = #tpu.dot_dimension_numbers<[1], [0], [0], [1], [0, 0, 1, 1], [], []>} : vector<1x512xf32>, vector<512x64xf32>, vector<1x64xf32> -> vector<1x64xf32>
    %c0_34 = arith.constant 0 : index
    %c0_35 = arith.constant 0 : index
    %106 = vector.load %arg7[%c0_34, %c0_35] : memref<64x16xf32, #tpu.memory_space<vmem>>, vector<64x16xf32>
    %cst_36 = arith.constant dense<0.000000e+00> : vector<1x16xf32>
    %107 = tpu.matmul %105, %106, %cst_36 {dimension_numbers = #tpu.dot_dimension_numbers<[1], [0], [0], [1], [0, 0, 1, 1], [], []>} : vector<1x64xf32>, vector<64x16xf32>, vector<1x16xf32> -> vector<1x16xf32>
    %c0_37 = arith.constant 0 : index
    %c0_38 = arith.constant 0 : index
    %108 = vector.load %arg8[%c0_37, %c0_38] : memref<1x16xf32, #tpu.memory_space<vmem>>, vector<1x16xf32>
    %109 = arith.addf %107, %108 : vector<1x16xf32>
    %cst_39 = arith.constant 0.000000e+00 : f32
    %110 = vector.broadcast %cst_39 : f32 to vector<1x16xf32>
    %111 = arith.maximumf %109, %110 : vector<1x16xf32>
    %c0_40 = arith.constant 0 : index
    %c0_41 = arith.constant 0 : index
    %112 = vector.load %arg9[%c0_40, %c0_41] : memref<16x64xf32, #tpu.memory_space<vmem>>, vector<16x64xf32>
    %cst_42 = arith.constant dense<0.000000e+00> : vector<1x64xf32>
    %113 = tpu.matmul %111, %112, %cst_42 {dimension_numbers = #tpu.dot_dimension_numbers<[1], [0], [0], [1], [0, 0, 1, 1], [], []>} : vector<1x16xf32>, vector<16x64xf32>, vector<1x64xf32> -> vector<1x64xf32>
    %c0_43 = arith.constant 0 : index
    %c0_44 = arith.constant 0 : index
    %114 = vector.load %arg10[%c0_43, %c0_44] : memref<1x64xf32, #tpu.memory_space<vmem>>, vector<1x64xf32>
    %115 = arith.addf %113, %114 : vector<1x64xf32>
    %cst_45 = arith.constant 3.000000e+00 : f32
    %116 = vector.broadcast %cst_45 : f32 to vector<1x64xf32>
    %117 = arith.addf %115, %116 : vector<1x64xf32>
    %cst_46 = arith.constant 0.000000e+00 : f32
    %cst_47 = arith.constant 6.000000e+00 : f32
    %118 = vector.broadcast %cst_46 : f32 to vector<1x64xf32>
    %119 = arith.maximumf %118, %117 : vector<1x64xf32>
    %120 = vector.broadcast %cst_47 : f32 to vector<1x64xf32>
    %121 = arith.minimumf %120, %119 : vector<1x64xf32>
    %cst_48 = arith.constant 0.166666672 : f32
    %122 = vector.broadcast %cst_48 : f32 to vector<1x64xf32>
    %123 = arith.mulf %121, %122 : vector<1x64xf32>
    %c0_49 = arith.constant 0 : index
    %c0_50 = arith.constant 0 : index
    %124 = vector.load %arg11[%c0_49, %c0_50] : memref<64x512xf32, #tpu.memory_space<vmem>>, vector<64x512xf32>
    %cst_51 = arith.constant dense<0.000000e+00> : vector<1x512xf32>
    %125 = tpu.matmul %123, %124, %cst_51 {dimension_numbers = #tpu.dot_dimension_numbers<[1], [0], [0], [1], [0, 0, 1, 1], [], []>} : vector<1x64xf32>, vector<64x512xf32>, vector<1x512xf32> -> vector<1x512xf32>
    %126 = vector.shape_cast %125 : vector<1x512xf32> to vector<1x1x512xf32>
    %127 = vector.broadcast %126 : vector<1x1x512xf32> to vector<1x8x512xf32>
    %128 = arith.mulf %102, %127 : vector<1x8x512xf32>
    %129 = vector.shape_cast %128 : vector<1x8x512xf32> to vector<8x512xf32>
    %c0_52 = arith.constant 0 : index
    %c0_53 = arith.constant 0 : index
    %130 = vector.load %arg12[%c0_52, %c0_53] : memref<512x128xf32, #tpu.memory_space<vmem>>, vector<512x128xf32>
    %cst_54 = arith.constant dense<0.000000e+00> : vector<8x128xf32>
    %131 = tpu.matmul %129, %130, %cst_54 {dimension_numbers = #tpu.dot_dimension_numbers<[1], [0], [0], [1], [0, 0, 1, 1], [], []>} : vector<8x512xf32>, vector<512x128xf32>, vector<8x128xf32> -> vector<8x128xf32>
    %c0_55 = arith.constant 0 : index
    %c0_56 = arith.constant 0 : index
    %132 = vector.load %arg13[%c0_55, %c0_56] : memref<1x128xf32, #tpu.memory_space<vmem>>, vector<1x128xf32>
    %133 = vector.broadcast %132 : vector<1x128xf32> to vector<8x128xf32>
    %134 = arith.addf %131, %133 : vector<8x128xf32>
    %135 = arith.addf %134, %1 : vector<8x128xf32>
    %136 = vector.shape_cast %135 : vector<8x128xf32> to vector<1x8x128xf32>
    %c0_57 = arith.constant 0 : index
    %c0_58 = arith.constant 0 : index
    %c0_59 = arith.constant 0 : index
    %137 = vector.load %arg14[%c0_57, %c0_58, %c0_59] : memref<1x8x128xf32, #tpu.memory_space<vmem>>, vector<1x8x128xf32>
    tpu.vector_store %arg14[%c0_57, %c0_58, %c0_59], %136 {strides = array<i32>} : memref<1x8x128xf32, #tpu.memory_space<vmem>>, vector<1x8x128xf32>,
    return
  }
  func.func @transform_0(%arg0: i32) -> (i32, i32, i32) {
    %c0_i32 = arith.constant 0 : i32
    %c0_i32_0 = arith.constant 0 : i32
    %c0_i32_1 = arith.constant 0 : i32
    return %arg0, %c0_i32, %c0_i32_0 : i32, i32, i32
  }
  func.func @transform_1(%arg0: i32) -> (i32, i32) {
    %c0_i32 = arith.constant 0 : i32
    %c0_i32_0 = arith.constant 0 : i32
    %c0_i32_1 = arith.constant 0 : i32
    return %c0_i32, %c0_i32_0 : i32, i32
  }
  func.func @transform_2(%arg0: i32) -> (i32, i32) {
    %c0_i32 = arith.constant 0 : i32
    %c0_i32_0 = arith.constant 0 : i32
    %c0_i32_1 = arith.constant 0 : i32
    return %c0_i32, %c0_i32_0 : i32, i32
  }
  func.func @transform_3(%arg0: i32) -> (i32, i32) {
    %c0_i32 = arith.constant 0 : i32
    %c0_i32_0 = arith.constant 0 : i32
    %c0_i32_1 = arith.constant 0 : i32
    return %c0_i32, %c0_i32_0 : i32, i32
  }
  func.func @transform_4(%arg0: i32) -> (i32, i32) {
    %c0_i32 = arith.constant 0 : i32
    %c0_i32_0 = arith.constant 0 : i32
    %c0_i32_1 = arith.constant 0 : i32
    return %c0_i32, %c0_i32_0 : i32, i32
  }
  func.func @transform_5(%arg0: i32) -> (i32, i32) {
    %c0_i32 = arith.constant 0 : i32
    %c0_i32_0 = arith.constant 0 : i32
    %c0_i32_1 = arith.constant 0 : i32
    return %c0_i32, %c0_i32_0 : i32, i32
  }
  func.func @transform_6(%arg0: i32) -> (i32, i32) {
    %c0_i32 = arith.constant 0 : i32
    %c0_i32_0 = arith.constant 0 : i32
    %c0_i32_1 = arith.constant 0 : i32
    return %c0_i32, %c0_i32_0 : i32, i32
  }
  func.func @transform_7(%arg0: i32) -> (i32, i32) {
    %c0_i32 = arith.constant 0 : i32
    %c0_i32_0 = arith.constant 0 : i32
    %c0_i32_1 = arith.constant 0 : i32
    return %c0_i32, %c0_i32_0 : i32, i32
  }
  func.func @transform_8(%arg0: i32) -> (i32, i32) {
    %c0_i32 = arith.constant 0 : i32
    %c0_i32_0 = arith.constant 0 : i32
    %c0_i32_1 = arith.constant 0 : i32
    return %c0_i32, %c0_i32_0 : i32, i32
  }
  func.func @transform_9(%arg0: i32) -> (i32, i32) {
    %c0_i32 = arith.constant 0 : i32
    %c0_i32_0 = arith.constant 0 : i32
    %c0_i32_1 = arith.constant 0 : i32
    return %c0_i32, %c0_i32_0 : i32, i32
  }
  func.func @transform_10(%arg0: i32) -> (i32, i32) {
    %c0_i32 = arith.constant 0 : i32
    %c0_i32_0 = arith.constant 0 : i32
    %c0_i32_1 = arith.constant 0 : i32
    return %c0_i32, %c0_i32_0 : i32, i32
  }
  func.func @transform_11(%arg0: i32) -> (i32, i32) {
    %c0_i32 = arith.constant 0 : i32
    %c0_i32_0 = arith.constant 0 : i32
    %c0_i32_1 = arith.constant 0 : i32
    return %c0_i32, %c0_i32_0 : i32, i32
  }
  func.func @transform_12(%arg0: i32) -> (i32, i32) {
    %c0_i32 = arith.constant 0 : i32
    %c0_i32_0 = arith.constant 0 : i32
    %c0_i32_1 = arith.constant 0 : i32
    return %c0_i32, %c0_i32_0 : i32, i32
  }
  func.func @transform_13(%arg0: i32) -> (i32, i32, i32) {
    %c0_i32 = arith.constant 0 : i32
    %c0_i32_0 = arith.constant 0 : i32
    %c0_i32_1 = arith.constant 0 : i32
    return %arg0, %c0_i32, %c0_i32_0 : i32, i32, i32
  }
}

</mosaic_0001>

<bundles_post_ra>
// kernel: tpu_custom_call.1
= control target key start
LH: loop header
LB: loop body
LE: loop exit
PB: predicated region body
PF: predicated region fallthrough
CT: control target
= control target key end

     0   :  { %s2862_s0 = inlined_call_operand.vmem [shape: f32[2,8,128], index: 0, kind: input, shape index: {}]   ;;  %s2863_s1 = inlined_call_operand.vmem [shape: f32[128,512], index: 1, kind: input, shape index: {}]   ;;  %s2864_s2 = inlined_call_operand.hbm [shape: f32[1,512], index: 2, kind: input, shape index: {}]   ;;  %s2865_s3 = inlined_call_operand.vmem [shape: f32[9,512], index: 3, kind: input, shape index: {}]   ;;  %s2866_s4 = inlined_call_operand.hbm [shape: f32[1,512], index: 4, kind: input, shape index: {}]   ;;  %s2867_s5 = inlined_call_operand.vmem [shape: f32[512,64], index: 5, kind: input, shape index: {}]   ;;  %s2868_s6 = inlined_call_operand.vmem [shape: f32[64,16], index: 6, kind: input, shape index: {}]   ;;  %s2869_s7 = inlined_call_operand.hbm [shape: f32[1,16], index: 7, kind: input, shape index: {}]   ;;  %s2870_s8 = inlined_call_operand.hbm [shape: f32[16,64], index: 8, kind: input, shape index: {}]   ;;  %s2871_s9 = inlined_call_operand.vmem [shape: f32[1,64], index: 9, kind: input, shape index: {}]   ;;  %s2872_s10 = inlined_call_operand.vmem [shape: f32[64,512], index: 10, kind: input, shape index: {}]   ;;  %s2873_s11 = inlined_call_operand.hbm [shape: f32[512,128], index: 11, kind: input, shape index: {}]   ;;  %s2874_s12 = inlined_call_operand.vmem [shape: f32[1,128], index: 12, kind: input, shape index: {}]   ;;  %s2875_s13 = inlined_call_operand.hbm [shape: f32[2,8,128], index: 13, kind: output, shape index: {}]  }
   0x1   :  { %2884 = sst [smem:[#allocation23_spill]] %s2866_s4 }
   0x2   :  { %2885 = sst [smem:[#allocation24_spill]] %s2870_s8 }
   0x3   :  { %18 = vsyncpa [#allocation3], 0 }
   0x4   :  { %19 = vsyncpa [#allocation6], 0 }
   0x5   :  { %20 = vsyncpa [#allocation9], 0 }
   0x6   :  { %21 = vsyncpa [#allocation4], 0 }
   0x7   :  { %23 = vsyncpa [#allocation4 + $0x1], 0  ;;  %s1960_s25 = smov 0   ;;  %s1962_s26 = smov 0  }
   0x8   :  { %s1964_s27 = smov 0   ;;  %s1966_s28 = smov 0  }
   0x9 LB: > { %2886 = sst [smem:[#allocation16_spill]] %s1868_s25  ;;  %s1981_s29 = sadd.s32 4294967295, %s1880_s28   ;;  %s1880_s28 = sphi %s1966_s28, %s2907_s28   ;;  %s1876_s27 = sphi %s1964_s27, %s2909_s27   ;;  %s1872_s26 = sphi %s1962_s26, %s2911_s26   ;;  %s1868_s25 = sphi %s1960_s25, %s2910_s25  }
   0xa   : > { %2887 = sst [smem:[#allocation17_spill]] %s1876_s27  ;;  %s1531_s30 = sadd.s32 4294967294, %s1880_s28  }
   0xb   : > { %2888 = sst [smem:[#allocation18_spill]] %s1880_s28  ;;  %s1985_s14 = sadd.s32 1, %s1880_s28  }
   0xc   : > { %2889 = sst [smem:[#allocation19_spill]] %s1985_s14  ;;  %s314_s15 = sadd.s32 1, %s1876_s27 }
   0xd   : > { %s311_s16 = ssub.s32 %s1880_s28, %s1985_s14  ;;  %p324_p0 = scmp.ne.s32.totalorder %s1876_s27, %s1872_s26 }
   0xe   : > { %p312_p1 = scmp.eq.s32.totalorder %s311_s16, 0  ;;  %p325_p2 = scmp.eq.s32.totalorder %s1981_s29, 1 }
   0xf   : > { %p330_p3 = scmp.ne.s32.totalorder %s1872_s26, %s1868_s25  ;;  %p331_p4 = scmp.eq.s32.totalorder %s1531_s30, 1 }
  0x10   : > { %s1996_s17 = scalar_select %p312_p1, %s1876_s27, %s314_s15  }
  0x11   : > { %p1998_p5 = por %p325_p2, %p324_p0  ;;  %p2002_p6 = por %p331_p4, %p330_p3 }
  0x12   : > { %2890 = sst [smem:[#allocation20_spill]] %s1996_s17  ;;  %p1532_p7 = scmp.ge.s32.totalorder %s1880_s28, 1 }
  0x13   : > { %s2891_s18 = scalar_select %p1998_p5, 1, 0 }
  0x14   : > { %s2893_s19 = scalar_select %p2002_p6, 1, 0 }
  0x15   : > { %2892 = sst [smem:[#allocation21_spill]] %s2891_s18  ;;  %p338_p8 = scmp.lt.s32.totalorder %s1880_s28, 3 }
  0x16   : > { %2894 = sst [smem:[#allocation22_spill]] %s2893_s19  ;;  %p1599_p9 = scmp.eq.s32.totalorder %s1981_s29, 0 }
  0x17   : > { %p2009_p10 = pnand %p1532_p7, %p338_p8  ;;  %s2896_s4 = sld [smem:[#allocation23_spill]] }
  0x18   : > { %s1882_s24 = smov [#allocation5]   ;;  %s2897_s8 = sld [smem:[#allocation24_spill]] }
  0x19   : > { %p1579_p11 = pneg %p2009_p10  ;;  %s370_s30 = sshll.u32 %s1882_s24, 4  ;;  %s371_s30 = int_to_ptr.vmem [resolvable:$true] %s370_s30 }
  0x1a   : > { %s1883_s21 = smov [#allocation8]   ;;  %s1884_s24 = smov 128  }
  0x1b   : > { %p2023_p12 = pnand %p1599_p9, %p1579_p11  ;;  %s399_s22 = sshll.u32 %s1883_s21, 4  ;;  %s400_s22 = int_to_ptr.vmem [resolvable:$true] %s399_s22 }
  0x1c   : > { %s1886_s14 = smov [#allocation2]   ;;  %s386_s21 = sshll.u32 %s2869_s7, 4  ;;  %s387_s21 = int_to_ptr.hbm [resolvable:$true] %s386_s21 }
  0x1d   : > { %s368_s23 = sshll.u32 %s2896_s4, 4  ;;  %s1885_s4 = smov 8   ;;  %s369_s23 = int_to_ptr.hbm [resolvable:$true] %s368_s23 }
  0x1e   : > { %s397_s17 = sshll.u32 %s2897_s8, 4  ;;  %s353_s8 = sshll.u32 %s2864_s2, 4  ;;  %s398_s17 = int_to_ptr.hbm [resolvable:$true] %s397_s17  ;;  %s354_s8 = int_to_ptr.hbm [resolvable:$true] %s353_s8 }
  0x1f   : > { %1585 = dma.hbm_to_vmem [thread:$0]  (!%p2023_p12), %s369_s23, 64, %s371_s30, [#allocation6]  }
  0x20   : > { %1591 = dma.hbm_to_vmem [thread:$0]  (!%p2023_p12), %s398_s17, 256, %s400_s22, [#allocation9], %s1884_s24, %s1884_s24, %s1885_s4  }
  0x21   : > { %s355_s19 = sshll.u32 %s1886_s14, 4  ;;  %s1887_s23 = smov [#allocation7]   ;;  %s356_s19 = int_to_ptr.vmem [resolvable:$true] %s355_s19 }
  0x22   : > { %1582 = dma.hbm_to_vmem [thread:$0]  (!%p2023_p12), %s354_s8, 64, %s356_s19, [#allocation3]  }
  0x23   : > { %s388_s30 = sshll.u32 %s1887_s23, 4  ;;  %s417_s22 = sshll.u32 %s2873_s11, 4  ;;  %s389_s30 = int_to_ptr.vmem [resolvable:$true] %s388_s30  ;;  %s418_s22 = int_to_ptr.hbm [resolvable:$true] %s417_s22 }
  0x24   : > { %1588 = dma.hbm_to_vmem [thread:$0]  (!%p2023_p12), %s387_s21, 16, %s389_s30, [#allocation6]  }
  0x25   : > { %s1888_s15 = smov [#allocation10]   ;;  %445 = sbr.rel (%p2009_p10) target bundleno = 1070 (0x42e), region = 72 }
  0x26   : > { %s419_s14 = sshll.u32 %s1888_s15, 4  ;;  %s420_s14 = int_to_ptr.vmem [resolvable:$true] %s419_s14 }
  0x27   : > { %1594 = dma.hbm_to_vmem [thread:$0]  (!%p2023_p12), %s418_s22, 8192, %s420_s14, [#allocation9], %s1884_s24, %s1884_s24, %s1885_s4  }
  0x2a   : > { %1851 = dma.done.wait (%p1599_p9), [#allocation3], 64  }
  0x2b   : > { %1853 = vsyncadd (%p1599_p9), [#allocation3], 4294967232 }
  0x2c   : > { %1855 = dma.done.wait (%p1599_p9), [#allocation6], 80  }
  0x2d   : > { %1857 = vsyncadd (%p1599_p9), [#allocation6], 4294967216 }
  0x2e   : > { %1859 = dma.done.wait (%p1599_p9), [#allocation9], 8448  }
  0x2f   : > { %1861 = vsyncadd (%p1599_p9), [#allocation9], 4294958848  ;;  %v575_v0 = vld [vmem:[%s2863_s1 + $0x1e8] sm:$0xff]  ;;  %v576_v1 = vld [vmem:[%s2863_s1 + $0x1f0] sm:$0xff]  ;;  %p509_p13 = scmp.lt.s32.totalorder %s1981_s29, 1  ;;  %s1889_s14 = smov 64  }
  0x30   : > { %v577_v2 = vld [vmem:[%s2863_s1 + $0x1f8] sm:$0xff]  ;;  %608 = vmatpush.msra.mxu1 %v575_v0  ;;  %628 = vmatpush.msra.mxu2 %v576_v1  ;;  %v571_v3 = vld [vmem:[%s2863_s1 + $0x1c8] sm:$0xff]  ;;  %v572_v4 = vld [vmem:[%s2863_s1 + $0x1d0] sm:$0xff]  ;;  %vm1077_vm5 = vcmask 523264   ;;  %vm1105_vm6 = vcmask 130048   ;;  %s506_s18 = sand.u32 1, %s1872_s26  }
  0x31   : > { %v573_v5 = vld [vmem:[%s2863_s1 + $0x1d8] sm:$0xff]  ;;  %648 = vmatpush.msra.mxu3 %v577_v2  ;;  %v567_v6 = vld [vmem:[%s2863_s1 + $0x1a8] sm:$0xff]  ;;  %v568_v7 = vld [vmem:[%s2863_s1 + $0x1b0] sm:$0xff]  ;;  %s2184_s30 = scalar_select %p509_p13, %s1981_s29, 1 }
  0x32   : > { %609 = vmatpush.msra.mxu1 %v571_v3  ;;  %629 = vmatpush.msra.mxu2 %v572_v4  ;;  %v569_v8 = vld [vmem:[%s2863_s1 + $0x1b8] sm:$0xff]  ;;  %v563_v9 = vld [vmem:[%s2863_s1 + $0x188] sm:$0xff]  ;;  %v564_v10 = vld [vmem:[%s2863_s1 + $0x190] sm:$0xff]  ;;  %s1545_s19 = sshll.u32 %s506_s18, 3  ;;  %s1826_s27 = scalar_lea.hbm %s2875_s13, 16 }
  0x33   : > { %649 = vmatpush.msra.mxu3 %v573_v5  ;;  %v574_v11 = vld [vmem:[%s2863_s1 + $0x1e0] sm:$0xff]  ;;  %v565_v12 = vld [vmem:[%s2863_s1 + $0x198] sm:$0xff]  ;;  %v559_v14 = vld [vmem:[%s2863_s1 + $0x168] sm:$0xff]  ;;  %s1546_s4 = sshll.u32 %s2184_s30, 3  ;;  %s508_s21 = scalar_lea.vmem [#allocation11], %s1545_s19 }
  0x34   : > { %610 = vmatpush.msra.mxu1 %v567_v6  ;;  %630 = vmatpush.msra.mxu2 %v568_v7  ;;  %v570_v13 = vld [vmem:[%s2863_s1 + $0x1c0] sm:$0xff]  ;;  %v560_v15 = vld [vmem:[%s2863_s1 + $0x170] sm:$0xff]  ;;  %v561_v16 = vld [vmem:[%s2863_s1 + $0x178] sm:$0xff]  ;;  %s2238_s15 = scalar_lea.vmem %s2862_s0, %s1546_s4  ;;  %s1554_s4 = sshll.u32 %s1981_s29, 3 }
  0x35   : > { %650 = vmatpush.msra.mxu3 %v569_v8  ;;  %588 = vmatpush.msra.mxu0 %v574_v11  ;;  %v566_v17 = vld [vmem:[%s2863_s1 + $0x1a0] sm:$0xff]  ;;  %v555_v18 = vld [vmem:[%s2863_s1 + $0x148] sm:$0xff]  ;;  %v556_v19 = vld [vmem:[%s2863_s1 + $0x150] sm:$0xff]  ;;  %s1417_s24 = scalar_lea.hbm %s2875_s13, %s1554_s4  ;;  %s1419_s23 = sshll.u32 %s508_s21, 4  ;;  %s1420_s23 = int_to_ptr.vmem [resolvable:$true] %s1419_s23 }
  0x36   : > { %611 = vmatpush.msra.mxu1 %v563_v9  ;;  %631 = vmatpush.msra.mxu2 %v564_v10  ;;  %v557_v20 = vld [vmem:[%s2863_s1 + $0x158] sm:$0xff]  ;;  %v562_v21 = vld [vmem:[%s2863_s1 + $0x180] sm:$0xff]  ;;  %v551_v22 = vld [vmem:[%s2863_s1 + $0x128] sm:$0xff]  ;;  %s1421_s17 = sshll.u32 %s1417_s24, 4  ;;  %s1407_s29 = scalar_lea.sflag [#allocation4], %s506_s18  ;;  %s1422_s17 = int_to_ptr.hbm [resolvable:$true] %s1421_s17 }
  0x37   : > { %651 = vmatpush.msra.mxu3 %v565_v12  ;;  %589 = vmatpush.msra.mxu0 %v570_v13  ;;  %v552_v23 = vld [vmem:[%s2863_s1 + $0x130] sm:$0xff]  ;;  %v553_v24 = vld [vmem:[%s2863_s1 + $0x138] sm:$0xff]  ;;  %v558_v25 = vld [vmem:[%s2863_s1 + $0x160] sm:$0xff]  ;;  %s1820_s22 = sshra.s32 %s1422_s17, 4  ;;  %s1821_s22 = int_to_ptr.hbm [resolvable:$true] %s1820_s22 }
  0x38   : > { %612 = vmatpush.msra.mxu1 %v559_v14  ;;  %632 = vmatpush.msra.mxu2 %v560_v15  ;;  %v547_v26 = vld [vmem:[%s2863_s1 + $0x108] sm:$0xff]  ;;  %v548_v27 = vld [vmem:[%s2863_s1 + $0x110] sm:$0xff]  ;;  %v549_v28 = vld [vmem:[%s2863_s1 + $0x118] sm:$0xff]  ;;  %p1827_p3 = scmp.lt.s32.totalorder %s1821_s22, %s2875_s13 }
  0x39   : > { %652 = vmatpush.msra.mxu3 %v561_v16  ;;  %590 = vmatpush.msra.mxu0 %v566_v17  ;;  %v554_v29 = vld [vmem:[%s2863_s1 + $0x140] sm:$0xff]  ;;  %v543_v30 = vld [vmem:[%s2863_s1 + $0xe8] sm:$0xff]  ;;  %v544_v31 = vld [vmem:[%s2863_s1 + $0xf0] sm:$0xff] }
  0x3a   : > { %613 = vmatpush.msra.mxu1 %v555_v18  ;;  %633 = vmatpush.msra.mxu2 %v556_v19  ;;  %v545_v32 = vld [vmem:[%s2863_s1 + $0xf8] sm:$0xff]  ;;  %v550_v33 = vld [vmem:[%s2863_s1 + $0x120] sm:$0xff]  ;;  %v539_v34 = vld [vmem:[%s2863_s1 + $0xc8] sm:$0xff] }
  0x3b   : > { %653 = vmatpush.msra.mxu3 %v557_v20  ;;  %591 = vmatpush.msra.mxu0 %v562_v21  ;;  %v540_v35 = vld [vmem:[%s2863_s1 + $0xd0] sm:$0xff]  ;;  %v541_v36 = vld [vmem:[%s2863_s1 + $0xd8] sm:$0xff]  ;;  %v546_v37 = vld [vmem:[%s2863_s1 + $0x100] sm:$0xff] }
  0x3c   : > { %614 = vmatpush.msra.mxu1 %v551_v22  ;;  %634 = vmatpush.msra.mxu2 %v552_v23  ;;  %v535_v38 = vld [vmem:[%s2863_s1 + $0xa8] sm:$0xff]  ;;  %v536_v39 = vld [vmem:[%s2863_s1 + $0xb0] sm:$0xff]  ;;  %v537_v40 = vld [vmem:[%s2863_s1 + $0xb8] sm:$0xff] }
  0x3d   : > { %654 = vmatpush.msra.mxu3 %v553_v24  ;;  %592 = vmatpush.msra.mxu0 %v558_v25  ;;  %v531_v41 = vld [vmem:[%s2863_s1 + $0x88] sm:$0xff]  ;;  %v542_v42 = vld [vmem:[%s2863_s1 + $0xe0] sm:$0xff]  ;;  %v532_v43 = vld [vmem:[%s2863_s1 + $0x90] sm:$0xff] }
  0x3e   : > { %615 = vmatpush.msra.mxu1 %v547_v26  ;;  %635 = vmatpush.msra.mxu2 %v548_v27  ;;  %v533_v44 = vld [vmem:[%s2863_s1 + $0x98] sm:$0xff]  ;;  %v527_v45 = vld [vmem:[%s2863_s1 + $0x68] sm:$0xff]  ;;  %v528_v46 = vld [vmem:[%s2863_s1 + $0x70] sm:$0xff] }
  0x3f   : > { %655 = vmatpush.msra.mxu3 %v549_v28  ;;  %593 = vmatpush.msra.mxu0 %v554_v29  ;;  %v529_v47 = vld [vmem:[%s2863_s1 + $0x78] sm:$0xff]  ;;  %v538_v48 = vld [vmem:[%s2863_s1 + $0xc0] sm:$0xff]  ;;  %v523_v50 = vld [vmem:[%s2863_s1 + $0x48] sm:$0xff] }
  0x40   : > { %616 = vmatpush.msra.mxu1 %v543_v30  ;;  %636 = vmatpush.msra.mxu2 %v544_v31  ;;  %v534_v49 = vld [vmem:[%s2863_s1 + $0xa0] sm:$0xff]  ;;  %v524_v51 = vld [vmem:[%s2863_s1 + $0x50] sm:$0xff]  ;;  %v525_v52 = vld [vmem:[%s2863_s1 + $0x58] sm:$0xff] }
  0x41   : > { %656 = vmatpush.msra.mxu3 %v545_v32  ;;  %594 = vmatpush.msra.mxu0 %v550_v33  ;;  %v530_v53 = vld [vmem:[%s2863_s1 + $0x80] sm:$0xff]  ;;  %v519_v54 = vld [vmem:[%s2863_s1 + $0x28] sm:$0xff]  ;;  %v520_v55 = vld [vmem:[%s2863_s1 + $0x30] sm:$0xff] }
  0x42   : > { %617 = vmatpush.msra.mxu1 %v539_v34  ;;  %637 = vmatpush.msra.mxu2 %v540_v35  ;;  %v521_v56 = vld [vmem:[%s2863_s1 + $0x38] sm:$0xff]  ;;  %v526_v57 = vld [vmem:[%s2863_s1 + $0x60] sm:$0xff]  ;;  %v515_v58 = vld [vmem:[%s2863_s1 + $0x8] sm:$0xff] }
  0x43   : > { %657 = vmatpush.msra.mxu3 %v541_v36  ;;  %595 = vmatpush.msra.mxu0 %v546_v37  ;;  %v516_v59 = vld [vmem:[%s2863_s1 + $0x10] sm:$0xff]  ;;  %v517_v60 = vld [vmem:[%s2863_s1 + $0x18] sm:$0xff]  ;;  %v513_v61 = vld [vmem:[%s2238_s15] sm:$0xff] }
  0x44   : > { %618 = vmatpush.msra.mxu1 %v535_v38  ;;  %638 = vmatpush.msra.mxu2 %v536_v39  ;;  %v522_v62 = vld [vmem:[%s2863_s1 + $0x40] sm:$0xff]  ;;  %v971_v34 = vld [vmem:[%s2867_s5 + $0x178] sm:$0xff]  ;;  %v2277_v35 = vld [vmem:[%s2865_s3 + $0x8] sm:$0xff] }
  0x45   : > { %658 = vmatpush.msra.mxu3 %v537_v40  ;;  %596 = vmatpush.msra.mxu0 %v542_v42  ;;  %v518_v63 = vld [vmem:[%s2863_s1 + $0x20] sm:$0xff]  ;;  %v2282_v36 = vld [vmem:[%s2865_s3 + $0x10] sm:$0xff]  ;;  %v2290_v38 = vld [vmem:[%s2865_s3 + $0x18] sm:$0xff]  ;;  %v755_v39 = vperm.slane %v2277_v35, 1  ;;  %v795_v40 = vperm.slane %v2277_v35, 4 }
  0x46   : > { %619 = vmatpush.msra.mxu1 %v531_v41  ;;  %639 = vmatpush.msra.mxu2 %v532_v43  ;;  %v514_v0 = vld [vmem:[%s2863_s1] sm:$0xff]  ;;  %v970_v37 = vld [vmem:[%s2867_s5 + $0x170] sm:$0xff]  ;;  %v969_v42 = vld [vmem:[%s2867_s5 + $0x168] sm:$0xff]  ;;  %v831_v43 = vperm.slane %v2277_v35, 7 }
  0x47   : > { %659 = vmatpush.msra.mxu3 %v533_v44  ;;  %597 = vmatpush.msra.mxu0 %v538_v48  ;;  %v578_v1 = vld [vmem:[#allocation2] sm:$0xf]  ;;  %v756_v44 = vperm.slane %v2282_v36, 1  ;;  %v832_v48 = vperm.slane %v2282_v36, 7 }
  0x48   : > { %620 = vmatpush.msra.mxu1 %v527_v45  ;;  %640 = vmatpush.msra.mxu2 %v528_v46  ;;  %v581_v2 = vperm.slane %v578_v1, 1  ;;  %v582_v6 = vperm.slane %v578_v1, 2  ;;  %v583_v7 = vperm.slane %v578_v1, 3  ;;  %v580_v9 = vperm.slane %v578_v1, 0  ;;  %v2297_v41 = vld [vmem:[%s2865_s3] sm:$0xff]  ;;  %v987_v46 = vld [vmem:[%s2867_s5 + $0x1f8] sm:$0xff] }
  0x49   : > { %660 = vmatpush.msra.mxu3 %v529_v47  ;;  %598 = vmatpush.msra.mxu0 %v534_v49  ;;  %v688_v45 = vlaneseq  ;;  %v796_v47 = vperm.slane %v2282_v36, 4  ;;  %v757_v49 = vperm.slane %v2290_v38, 1 }
  0x4a   : > { %621 = vmatpush.msra.mxu1 %v523_v50  ;;  %641 = vmatpush.msra.mxu2 %v524_v51  ;;  %v955_v50 = vld [vmem:[%s2867_s5 + $0xf8] sm:$0xff]  ;;  %v968_v51 = vld [vmem:[%s2867_s5 + $0x160] sm:$0xff] }
  0x4b   : > { %661 = vmatpush.msra.mxu3 %v525_v52  ;;  %599 = vmatpush.msra.mxu0 %v530_v53  ;;  %v754_v52 = vperm.slane %v2297_v41, 1  ;;  %v797_v53 = vperm.slane %v2290_v38, 4  ;;  %v2342_v1 = vand.u32 127, %v688_v45 }
  0x4c   : > { %622 = vmatpush.msra.mxu1 %v519_v54  ;;  %642 = vmatpush.msra.mxu2 %v520_v55  ;;  %v833_v54 = vperm.slane %v2290_v38, 7  ;;  %v939_v55 = vld [vmem:[%s2867_s5 + $0x78] sm:$0xff] }
  0x4d   : > { %662 = vmatpush.msra.mxu3 %v521_v56  ;;  %600 = vmatpush.msra.mxu0 %v526_v57  ;;  %v986_v56 = vld [vmem:[%s2867_s5 + $0x1f0] sm:$0xff]  ;;  %vm725_vm0 = vcmp.lt.s32.totalorder %v2342_v1, 64  ;;  %vm707_vm1 = vcmp.ge.s32.totalorder %v2342_v1, 64 }
  0x4e   : > { %623 = vmatpush.msra.mxu1 %v515_v58  ;;  %643 = vmatpush.msra.mxu2 %v516_v59 }
  0x4f   : > { %663 = vmatpush.msra.mxu3 %v517_v60  ;;  %624 = vmatmul.f32.vlgmr.msra.gmra.mxu1 %v513_v61  ;;  %v794_v60 = vperm.slane %v2297_v41, 4 }
  0x50   : > { %644 = vmatmul.f32.vlgmr.msra.gmra.mxu2 %v513_v61  ;;  %664 = vmatmul.f32.vlgmr.msra.gmra.mxu3 %v513_v61 }
  0x51   : > { %601 = vmatpush.msra.mxu0 %v522_v62  ;;  %1028 = vmatpush.msrb.mxu2 %v971_v34  ;;  %v967_v62 = vld [vmem:[%s2867_s5 + $0x158] sm:$0xff]  ;;  %v964_v34 = vld [vmem:[%s2867_s5 + $0x140] sm:$0xff] }
  0x52   : > { %1048 = vmatpush.msrb.mxu3 %v987_v46  ;;  %1008 = vmatpush.msrb.mxu1 %v955_v50  ;;  %v950_v46 = vld [vmem:[%s2867_s5 + $0xd0] sm:$0xff] }
  0x53   : > { %602 = vmatpush.msra.mxu0 %v518_v63  ;;  %1029 = vmatpush.msrb.mxu2 %v970_v37  ;;  %v935_v37 = vld [vmem:[%s2867_s5 + $0x58] sm:$0xff]  ;;  %v934_v50 = vld [vmem:[%s2867_s5 + $0x50] sm:$0xff] }
  0x54   : > { %1049 = vmatpush.msrb.mxu3 %v986_v56  ;;  %v746_v56 = vperm.slane %v2297_v41, 0 }
  0x55   : > { %603 = vmatpush.msra.mxu0 %v514_v0  ;;  %1030 = vmatpush.msrb.mxu2 %v969_v42  ;;  %v747_v42 = vperm.slane %v2277_v35, 0 }
  0x56   : > { %604 = vmatmul.f32.vlgmr.msra.gmra.mxu0 %v513_v61  ;;  %v954_v61 = vld [vmem:[%s2867_s5 + $0xf0] sm:$0xff] }
  0x57   : > { %1031 = vmatpush.msrb.mxu2 %v968_v51  ;;  %988 = vmatpush.msrb.mxu0 %v939_v55  ;;  %v981_v51 = vld [vmem:[%s2867_s5 + $0x1c8] sm:$0xff] }
  0x58   : > { %1009 = vmatpush.msrb.mxu1 %v954_v61  ;;  %v1651_v61 = vld [vmem:[%s2865_s3 + $0x30] ss:$0 sm:$0xff]  ;;  %v941_v55 = vld [vmem:[%s2867_s5 + $0x88] sm:$0xff] }
  0x59   : > { %1032 = vmatpush.msrb.mxu2 %v967_v62 }
  0xcc   : > { %v625_v3 = vpop.f32.mrf.mxu1 }
  0xcd   : > { %v626_v4 = vadd.f32 %v625_v3, %v581_v2  ;;  %v2344_v2 = vshrl.u32 %v688_v45, 7  ;;  %v938_v3 = vld [vmem:[%s2867_s5 + $0x70] sm:$0xff] }
  0xce   : > { %989 = vmatpush.msrb.mxu0 %v938_v3  ;;  %v982_v45 = vld [vmem:[%s2867_s5 + $0x1d0] sm:$0xff]  ;;  %v786_v3 = vperm.slane %v2297_v41, 3 }
  0xcf   : > { %v669_v5 = vadd.f32 3.0, %v626_v4 }
  0xd1   : > { %v673_v8 = vmax.f32 %v669_v5, 0.0 }
  0xd3   : > { %v677_v10 = vmin.f32 %v673_v8, 6.0  ;;  %v645_v11 = vpop.f32.mrf.mxu2  ;;  %v665_v12 = vpop.f32.mrf.mxu3  ;;  %v830_v8 = vperm.slane %v2297_v41, 7 }
  0xd4   : > { %v646_v13 = vadd.f32 %v645_v11, %v582_v6  ;;  %v666_v14 = vadd.f32 %v665_v12, %v583_v7  ;;  %v605_v15 = vpop.f32.mrf.mxu0  ;;  %v748_v11 = vperm.slane %v2282_v36, 0 }
  0xd5   : > { %v681_v16 = vmul.f32 %v677_v10, %v626_v4  ;;  %v606_v17 = vadd.f32 %v605_v15, %v580_v9  ;;  %v985_v4 = vld [vmem:[%s2867_s5 + $0x1e8] sm:$0xff]  ;;  %v966_v10 = vld [vmem:[%s2867_s5 + $0x150] sm:$0xff] }
  0xd6   : > { %v670_v18 = vadd.f32 3.0, %v646_v13  ;;  %v671_v19 = vadd.f32 3.0, %v666_v14  ;;  %1050 = vmatpush.msrb.mxu3 %v985_v4  ;;  %v953_v9 = vld [vmem:[%s2867_s5 + $0xe8] sm:$0xff]  ;;  %1033 = vmatpush.msrb.mxu2 %v966_v10  ;;  %v809_v4 = vperm.slane %v2290_v38, 5 }
  0xd7   : > { %v685_v20 = vmul.f32 0.16666667, %v681_v16  ;;  %v668_v21 = vadd.f32 3.0, %v606_v17  ;;  %1010 = vmatpush.msrb.mxu1 %v953_v9  ;;  %v937_v15 = vld [vmem:[%s2867_s5 + $0x68] sm:$0xff]  ;;  %v984_v16 = vld [vmem:[%s2867_s5 + $0x1e0] sm:$0xff] }
  0xd8   : > { %v674_v22 = vmax.f32 %v670_v18, 0.0  ;;  %v675_v23 = vmax.f32 %v671_v19, 0.0  ;;  %v767_v18 = vperm.slane %v2277_v35, 2  ;;  %v768_v19 = vperm.slane %v2282_v36, 2  ;;  %990 = vmatpush.msrb.mxu0 %v937_v15  ;;  %1051 = vmatpush.msrb.mxu3 %v984_v16 }
  0xd9   : > { %719 = vrot.lane.b32.xlu0 %v685_v20, %s1889_s14  ;;  %v672_v26 = vmax.f32 %v668_v21, 0.0  ;;  %v2325_v57 = vmul.f32 %v755_v39, %v685_v20  ;;  %v2327_v58 = vmul.f32 %v795_v40, %v685_v20  ;;  %v2338_v63 = vmul.f32 %v831_v43, %v685_v20  ;;  %v952_v21 = vld [vmem:[%s2867_s5 + $0xe0] sm:$0xff] }
  0xda   : > { %v678_v24 = vmin.f32 %v674_v22, 6.0  ;;  %v679_v25 = vmin.f32 %v675_v23, 6.0  ;;  %v2386_v20 = vadd.s32 384, %v2342_v1  ;;  %v965_v22 = vld [vmem:[%s2867_s5 + $0x148] sm:$0xff]  ;;  %v699_v23 = vand.u32 7, %v2344_v2  ;;  %1011 = vmatpush.msrb.mxu1 %v952_v21  ;;  %v980_v21 = vld [vmem:[%s2867_s5 + $0x1c0] sm:$0xff] }
  0xdb   : > { %v676_v30 = vmin.f32 %v672_v26, 6.0  ;;  %1034 = vmatpush.msrb.mxu2 %v965_v22  ;;  %v936_v26 = vld [vmem:[%s2867_s5 + $0x60] sm:$0xff]  ;;  %v825_v40 = vperm.slane %v2290_v38, 6  ;;  %v766_v43 = vperm.slane %v2297_v41, 2  ;;  %v769_v2 = vperm.slane %v2290_v38, 2  ;;  %v930_v1 = vld [vmem:[%s2867_s5 + $0x30] sm:$0xff] }
  0xdc   : > { %v682_v27 = vmul.f32 %v678_v24, %v646_v13  ;;  %v683_v28 = vmul.f32 %v679_v25, %v666_v14  ;;  %v788_v24 = vperm.slane %v2282_v36, 3  ;;  %v789_v25 = vperm.slane %v2290_v38, 3  ;;  %991 = vmatpush.msrb.mxu0 %v936_v26 }
  0xdd   : > { %v680_v32 = vmul.f32 %v676_v30, %v606_v17  ;;  %v749_v17 = vperm.slane %v2290_v38, 0  ;;  %v824_v30 = vperm.slane %v2282_v36, 6  ;;  %1035 = vmatpush.msrb.mxu2 %v964_v34  ;;  %vm714_vm2 = vcmp.lt.s32.totalorder %v2386_v20, 448  ;;  %v928_v38 = vld [vmem:[%s2867_s5 + $0x20] sm:$0xff] }
  0xde   : > { %v2265_v29 = vmul.f32 0.16666667, %v683_v28  ;;  %v686_v31 = vmul.f32 0.16666667, %v682_v27  ;;  %v983_v27 = vld [vmem:[%s2867_s5 + $0x1d8] sm:$0xff]  ;;  %v807_v28 = vperm.slane %v2277_v35, 5  ;;  %992 = vmatpush.msrb.mxu0 %v935_v37 }
  0xdf   : > { %v2268_v33 = vmul.f32 0.16666667, %v680_v32  ;;  %1052 = vmatpush.msrb.mxu3 %v983_v27  ;;  %v951_v32 = vld [vmem:[%s2867_s5 + $0xd8] sm:$0xff]  ;;  %vm2455_vm3 = vcmp.gt.s32.totalorder %v699_v23, 0  ;;  %vm2485_vm4 = vcmp.lt.s32.totalorder %v699_v23, 7  ;;  %v932_v23 = vld [vmem:[%s2867_s5 + $0x40] sm:$0xff] }
  0xe0   : > { %723 = vrot.lane.b32.xlu1 %v2265_v29, %s1889_s14  ;;  %v2340_v0 = vmul.f32 %v756_v44, %v686_v31  ;;  %v2352_v5 = vmul.f32 %v796_v47, %v686_v31  ;;  %v2354_v6 = vmul.f32 %v832_v48, %v686_v31  ;;  %v2357_v7 = vmul.f32 %v757_v49, %v2265_v29  ;;  %v963_v47 = vld [vmem:[%s2867_s5 + $0x138] sm:$0xff] }
  0xe1   : > { %721 = vrot.lane.b32.xlu0 %v686_v31, %s1889_s14  ;;  %v2368_v12 = vmul.f32 %v797_v53, %v2265_v29  ;;  %v2371_v13 = vmul.f32 %v833_v54, %v2265_v29  ;;  %v2374_v14 = vmul.f32 %v754_v52, %v2268_v33  ;;  %v808_v29 = vperm.slane %v2282_v36, 5  ;;  %1012 = vmatpush.msrb.mxu1 %v951_v32  ;;  %v1650_v52 = vld [vmem:[%s2865_s3 + $0x28] ss:$0 sm:$0xff] }
  0xe2   : > { %v2408_v31 = vmul.f32 %v794_v60, %v2268_v33  ;;  %v2425_v44 = vmul.f32 %v830_v8, %v2268_v33  ;;  %v806_v49 = vperm.slane %v2297_v41, 5  ;;  %1053 = vmatpush.msrb.mxu3 %v982_v45  ;;  %1036 = vmatpush.msrb.mxu2 %v963_v47  ;;  %v949_v60 = vld [vmem:[%s2867_s5 + $0xc8] sm:$0xff]  ;;  %v962_v8 = vld [vmem:[%s2867_s5 + $0x130] sm:$0xff] }
  0xe3   : > { %1013 = vmatpush.msrb.mxu1 %v950_v46  ;;  %993 = vmatpush.msrb.mxu0 %v934_v50  ;;  %v931_v50 = vld [vmem:[%s2867_s5 + $0x38] sm:$0xff] }
  0xe4   : > { %1054 = vmatpush.msrb.mxu3 %v981_v51  ;;  %1037 = vmatpush.msrb.mxu2 %v962_v8  ;;  %v978_v51 = vld [vmem:[%s2867_s5 + $0x1b0] sm:$0xff]  ;;  %v959_v8 = vld [vmem:[%s2867_s5 + $0x118] sm:$0xff] }
  0xe5   : > { %1014 = vmatpush.msrb.mxu1 %v949_v60  ;;  %v2536_v60 = vld [vmem:[#allocation5] sm:$0xf] }
  0xe6   : > { %1055 = vmatpush.msrb.mxu3 %v980_v21 }
  0xe8   : > { %717 = vrot.lane.b32.xlu1 %v2268_v33, %s1889_s14  ;;  %v787_v33 = vperm.slane %v2277_v35, 3  ;;  %s1822_s14 = scalar_lea.hbm %s1821_s22, 8 }
  0xe9   : > { %p1823_p0 = scmp.ne.s32.totalorder %s1821_s22, %s1822_s14  ;;  %p1828_p4 = scmp.lt.s32.totalorder %s1826_s27, %s1822_s14 }
  0xeb   : > { %p1824_p1 = pnand %p1823_p0, %p1998_p5  ;;  %p1829_p7 = por %p1828_p4, %p1827_p3 }
  0xed   : > { %p1825_p2 = pneg %p1824_p1 }
  0xef   : > { %p1830_p8 = pnand %p1829_p7, %p1825_p2 }
 0x14b   : > { %v2329_v59 = vpop.permute.xlu0 %719 }
 0x152   : > { %v2419_v39 = vpop.permute.xlu1 %723 }
 0x153   : > { %v722_v48 = vpop.permute.xlu0 %721 }
 0x154   : > { %v726_v53 = vsel %vm725_vm0, %v722_v48, %v2419_v39  ;;  %v727_v54 = vsel %vm725_vm0, %v2329_v59, %v722_v48 }
 0x155   : > { %v752_v62 = vmul.f32 %v748_v11, %v727_v54  ;;  %v753_v9 = vmul.f32 %v749_v17, %v726_v53  ;;  %v2472_v10 = vmul.f32 %v767_v18, %v727_v54  ;;  %v792_v15 = vmul.f32 %v788_v24, %v727_v54  ;;  %v933_v11 = vld [vmem:[%s2867_s5 + $0x48] sm:$0xff]  ;;  %v948_v24 = vld [vmem:[%s2867_s5 + $0xc0] sm:$0xff] }
 0x156   : > { %v793_v16 = vmul.f32 %v789_v25, %v726_v53  ;;  %v772_v26 = vmul.f32 %v768_v19, %v726_v53  ;;  %v2483_v27 = vmul.f32 %v807_v28, %v727_v54  ;;  %v828_v17 = vmul.f32 %v824_v30, %v727_v54  ;;  %v961_v25 = vld [vmem:[%s2867_s5 + $0x128] sm:$0xff]  ;;  %v979_v30 = vld [vmem:[%s2867_s5 + $0x1b8] sm:$0xff]  ;;  %994 = vmatpush.msrb.mxu0 %v933_v11 }
 0x157   : > { %v764_v22 = vadd.f32 %v2340_v0, %v752_v62  ;;  %v804_v0 = vadd.f32 %v2352_v5, %v792_v15  ;;  %v812_v36 = vmul.f32 %v808_v29, %v726_v53  ;;  %v2496_v19 = vmul.f32 %v825_v40, %v726_v53  ;;  %v947_v29 = vld [vmem:[%s2867_s5 + $0xb8] sm:$0xff]  ;;  %v960_v40 = vld [vmem:[%s2867_s5 + $0x120] sm:$0xff]  ;;  %1015 = vmatpush.msrb.mxu1 %v948_v24  ;;  %v977_v15 = vld [vmem:[%s2867_s5 + $0x1a8] sm:$0xff] }
 0x158   : > { %v2498_v28 = vmul.f32 %v1650_v52, %v727_v54  ;;  %v840_v34 = vadd.f32 %v2354_v6, %v828_v17  ;;  %v848_v37 = vmul.f32 %v1651_v61, %v726_v53  ;;  %v822_v5 = vperm.slane %v2297_v41, 6  ;;  %1038 = vmatpush.msrb.mxu2 %v961_v25  ;;  %995 = vmatpush.msrb.mxu0 %v932_v23  ;;  %v946_v54 = vld [vmem:[%s2867_s5 + $0xb0] sm:$0xff]  ;;  %v976_v17 = vld [vmem:[%s2867_s5 + $0x1a0] sm:$0xff] }
 0x159   : > { %v776_v32 = vadd.f32 %v772_v26, %v764_v22  ;;  %v816_v45 = vadd.f32 %v812_v36, %v804_v0  ;;  %v765_v46 = vadd.f32 %v2357_v7, %v753_v9  ;;  %v2516_v47 = vadd.f32 %v2368_v12, %v793_v16  ;;  %1056 = vmatpush.msrb.mxu3 %v979_v30  ;;  %v958_v22 = vld [vmem:[%s2867_s5 + $0x110] sm:$0xff]  ;;  %v944_v23 = vld [vmem:[%s2867_s5 + $0xa0] sm:$0xff]  ;;  %v957_v30 = vld [vmem:[%s2867_s5 + $0x108] sm:$0xff] }
 0x15a   : > { %v823_v6 = vperm.slane %v2277_v35, 6  ;;  %v718_v48 = vpop.permute.xlu1 %717  ;;  %v852_v53 = vadd.f32 %v848_v37, %v840_v34  ;;  %1016 = vmatpush.msrb.mxu1 %v947_v29  ;;  %1039 = vmatpush.msrb.mxu2 %v960_v40  ;;  %v870_v24 = vperm.slane %v2536_v60, 2  ;;  %v943_v29 = vld [vmem:[%s2867_s5 + $0x98] sm:$0xff]  ;;  %v956_v40 = vld [vmem:[%s2867_s5 + $0x100] sm:$0xff] }
 0x15b   : > { %v780_v52 = vrot.slane %v776_v32, 7  ;;  %v2528_v7 = vsel %vm725_vm0, %v718_v48, %v2329_v59  ;;  %v729_v12 = vsel %vm725_vm0, %v2419_v39, %v718_v48  ;;  %996 = vmatpush.msrb.mxu0 %v931_v50  ;;  %1057 = vmatpush.msrb.mxu3 %v978_v51  ;;  %v974_v48 = vld [vmem:[%s2867_s5 + $0x190] sm:$0xff] }
 0x15c   : > { %v730_v61 = vsel %vm707_vm1, %v729_v12, 0.0  ;;  %v2542_v62 = vsel %vm714_vm2, %v729_v12, 0.0  ;;  %v751_v59 = vmul.f32 %v747_v42, %v2528_v7  ;;  %v770_v39 = vmul.f32 %v766_v43, %v2528_v7  ;;  %1017 = vmatpush.msrb.mxu1 %v946_v54  ;;  %1040 = vmatpush.msrb.mxu2 %v959_v8  ;;  %v942_v51 = vld [vmem:[%s2867_s5 + $0x90] sm:$0xff] }
 0x15d   : > { %v856_v20 = vrot.slane %v852_v53, 1  ;;  %v784_v9 = vsel %vm2455_vm3, %v780_v52, 0.0  ;;  %v750_v42 = vmul.f32 %v746_v56, %v730_v61  ;;  %v773_v43 = vmul.f32 %v769_v2, %v2542_v62  ;;  %v945_v2 = vld [vmem:[%s2867_s5 + $0xa8] sm:$0xff]  ;;  %997 = vmatpush.msrb.mxu0 %v930_v1  ;;  %1058 = vmatpush.msrb.mxu3 %v977_v15  ;;  %v940_v15 = vld [vmem:[%s2867_s5 + $0x80] sm:$0xff] }
 0x15e   : > { %v820_v16 = vadd.f32 %v816_v45, %v784_v9  ;;  %v763_v11 = vadd.f32 %v2325_v57, %v751_v59  ;;  %v790_v21 = vmul.f32 %v786_v3, %v730_v61  ;;  %v791_v56 = vmul.f32 %v787_v33, %v2528_v7  ;;  %v1652_v57 = vld [vmem:[%s2865_s3 + $0x20] ss:$0 sm:$0xff]  ;;  %v929_v33 = vld [vmem:[%s2867_s5 + $0x28] sm:$0xff]  ;;  %1018 = vmatpush.msrb.mxu1 %v945_v2 }
 0x15f   : > { %v762_v26 = vadd.f32 %v2374_v14, %v750_v42  ;;  %v777_v3 = vadd.f32 %v773_v43, %v765_v46  ;;  %v810_v35 = vmul.f32 %v806_v49, %v2528_v7  ;;  %v1653_v14 = vld [vmem:[%s2865_s3 + $0x38] ss:$0 sm:$0xff]  ;;  %v813_v36 = vmul.f32 %v809_v4, %v2542_v62  ;;  %1041 = vmatpush.msrb.mxu2 %v958_v22  ;;  %v972_v9 = vld [vmem:[%s2867_s5 + $0x180] sm:$0xff] }
 0x160   : > { %v775_v25 = vadd.f32 %v2472_v10, %v763_v11  ;;  %v802_v49 = vadd.f32 %v2408_v31, %v790_v21  ;;  %v803_v0 = vadd.f32 %v2327_v58, %v791_v56  ;;  %v826_v31 = vmul.f32 %v822_v5, %v730_v61  ;;  %v975_v4 = vld [vmem:[%s2867_s5 + $0x198] sm:$0xff]  ;;  %998 = vmatpush.msrb.mxu0 %v929_v33  ;;  %v973_v61 = vld [vmem:[%s2867_s5 + $0x188] sm:$0xff]  ;;  %v924_v22 = vld [vmem:[%s2867_s5] sm:$0xff] }
 0x161   : > { %v774_v32 = vadd.f32 %v770_v39, %v762_v26  ;;  %v781_v34 = vrot.slane %v777_v3, 7  ;;  %v827_v58 = vmul.f32 %v823_v6, %v2528_v7  ;;  %v841_v10 = vadd.f32 %v2371_v13, %v2496_v19  ;;  %1059 = vmatpush.msrb.mxu3 %v976_v17  ;;  %1019 = vmatpush.msrb.mxu1 %v944_v23  ;;  %v927_v6 = vld [vmem:[%s2867_s5 + $0x18] sm:$0xff] }
 0x162   : > { %v860_v37 = vsel %vm2485_vm4, %v856_v20, 0.0  ;;  %v779_v41 = vrot.slane %v775_v25, 7  ;;  %v814_v5 = vadd.f32 %v810_v35, %v802_v49  ;;  %v815_v46 = vadd.f32 %v2483_v27, %v803_v0  ;;  %1042 = vmatpush.msrb.mxu2 %v957_v30  ;;  %999 = vmatpush.msrb.mxu0 %v928_v38  ;;  %v925_v20 = vld [vmem:[%s2867_s5 + $0x8] sm:$0xff] }
 0x163   : > { %v778_v45 = vrot.slane %v774_v32, 7  ;;  %v838_v13 = vadd.f32 %v2425_v44, %v826_v31  ;;  %v839_v19 = vadd.f32 %v2338_v63, %v827_v58  ;;  %v785_v27 = vsel %vm2455_vm3, %v781_v34, 0.0  ;;  %1060 = vmatpush.msrb.mxu3 %v975_v4  ;;  %1020 = vmatpush.msrb.mxu1 %v943_v29  ;;  %v1072_v31 = vld [vmem:[%s2868_s6 + $0x20] sm:$0xff] }
 0x164   : > { %v783_v50 = vsel %vm2455_vm3, %v779_v41, 0.0  ;;  %v846_v44 = vmul.f32 %v1652_v57, %v2528_v7  ;;  %v849_v63 = vmul.f32 %v1653_v14, %v2542_v62  ;;  %v817_v53 = vadd.f32 %v813_v36, %v2516_v47  ;;  %1043 = vmatpush.msrb.mxu2 %v956_v40  ;;  %v926_v7 = vld [vmem:[%s2867_s5 + $0x10] sm:$0xff]  ;;  %1000 = vmatpush.msrb.mxu0 %v927_v6  ;;  %v1073_v36 = vld [vmem:[%s2868_s6 + $0x28] sm:$0xff] }
 0x165   : > { %v782_v52 = vsel %vm2455_vm3, %v778_v45, 0.0  ;;  %v851_v12 = vadd.f32 %v2498_v28, %v839_v19  ;;  %v864_v54 = vadd.f32 %v860_v37, %v820_v16  ;;  %v819_v62 = vadd.f32 %v815_v46, %v783_v50  ;;  %1061 = vmatpush.msrb.mxu3 %v974_v48  ;;  %1021 = vmatpush.msrb.mxu1 %v942_v51  ;;  %v1074_v14 = vld [vmem:[%s2868_s6 + $0x30] sm:$0xff] }
 0x166   : > { %v850_v59 = vadd.f32 %v846_v44, %v838_v13  ;;  %v853_v39 = vadd.f32 %v849_v63, %v841_v10  ;;  %v818_v28 = vadd.f32 %v814_v5, %v782_v52  ;;  %v821_v47 = vadd.f32 %v817_v53, %v785_v27  ;;  %1001 = vmatpush.msrb.mxu0 %v926_v7 }
 0x167   : > { %v855_v8 = vrot.slane %v851_v12, 1  ;;  %v878_v1 = vadd.f32 %v870_v24, %v864_v54  ;;  %1062 = vmatpush.msrb.mxu3 %v973_v61  ;;  %v869_v16 = vperm.slane %v2536_v60, 1  ;;  %v868_v11 = vperm.slane %v2536_v60, 0  ;;  %1022 = vmatpush.msrb.mxu1 %v941_v55 }
 0x168   : > { %v854_v42 = vrot.slane %v850_v59, 1  ;;  %v857_v43 = vrot.slane %v853_v39, 1  ;;  %v871_v21 = vperm.slane %v2536_v60, 3  ;;  %1002 = vmatpush.msrb.mxu0 %v925_v20  ;;  %v1075_v60 = vld [vmem:[%s2868_s6 + $0x38] sm:$0xff] }
 0x169   : > { %v859_v56 = vsel %vm2485_vm4, %v855_v8, 0.0  ;;  %v882_v2 = vadd.f32 3.0, %v878_v1  ;;  %1063 = vmatpush.msrb.mxu3 %v972_v9  ;;  %1023 = vmatpush.msrb.mxu1 %v940_v15  ;;  %v1069_v15 = vld [vmem:[%s2868_s6 + $0x8] sm:$0xff] }
 0x16a   : > { %v858_v57 = vsel %vm2485_vm4, %v854_v42, 0.0  ;;  %v861_v26 = vsel %vm2485_vm4, %v857_v43, 0.0  ;;  %v863_v3 = vadd.f32 %v859_v56, %v819_v62  ;;  %1003 = vmatpush.msrb.mxu0 %v924_v22  ;;  %v1071_v42 = vld [vmem:[%s2868_s6 + $0x18] sm:$0xff]  ;;  %v1070_v43 = vld [vmem:[%s2868_s6 + $0x10] sm:$0xff] }
 0x16b   : > { %v862_v35 = vadd.f32 %v858_v57, %v818_v28  ;;  %v865_v33 = vadd.f32 %v861_v26, %v821_v47  ;;  %v886_v17 = vmax.f32 %v882_v2, 0.0 }
 0x16c   : > { %v877_v24 = vadd.f32 %v869_v16, %v863_v3  ;;  %1089 = vmatpush.msra.mxu0 %v1075_v60  ;;  %v1068_v16 = vld [vmem:[%s2868_s6] sm:$0xff]  ;;  %v1102_v60 = vld [vmem:[#allocation8] sm:$0xff] }
 0x16d   : > { %v876_v25 = vadd.f32 %v868_v11, %v862_v35  ;;  %v879_v18 = vadd.f32 %v871_v21, %v865_v33  ;;  %v890_v49 = vmin.f32 %v886_v17, 6.0  ;;  %v1103_v11 = vld [vmem:[#allocation8 + $0x8] sm:$0xff]  ;;  %v1161_v35 = vld [vmem:[%s2872_s10 + $0xe0] sm:$0xff]  ;;  %v1162_v33 = vld [vmem:[%s2872_s10 + $0xe8] sm:$0xff] }
 0x16e   : > { %v881_v0 = vadd.f32 3.0, %v877_v24  ;;  %1090 = vmatpush.msra.mxu0 %v1074_v14  ;;  %1123 = vmatpush.msra.mxu1 %v1103_v11  ;;  %v1163_v17 = vld [vmem:[%s2872_s10 + $0xf0] sm:$0xff]  ;;  %v1157_v14 = vld [vmem:[%s2872_s10 + $0xc0] sm:$0xff] }
 0x16f   : > { %v883_v23 = vadd.f32 3.0, %v879_v18  ;;  %v894_v30 = vmul.f32 %v890_v49, %v878_v1  ;;  %v880_v32 = vadd.f32 3.0, %v876_v25  ;;  %1176 = vmatpush.msra.mxu2 %v1161_v35  ;;  %1196 = vmatpush.msra.mxu3 %v1162_v33  ;;  %v1160_v49 = vld [vmem:[%s2872_s10 + $0xd8] sm:$0xff]  ;;  %v1297_v35 = vld [vmem:[#allocation10 + $0x148] sm:$0xff] }
 0x170   : > { %v885_v34 = vmax.f32 %v881_v0, 0.0  ;;  %1091 = vmatpush.msra.mxu0 %v1073_v36  ;;  %1124 = vmatpush.msra.mxu1 %v1102_v60  ;;  %v1076_v0 = vld [vmem:[#allocation7] sm:$0x1]  ;;  %v1284_v11 = vld [vmem:[#allocation10 + $0xe0] sm:$0xff]  ;;  %v1282_v60 = vld [vmem:[#allocation10 + $0xd0] sm:$0xff] }
 0x171   : > { %v887_v58 = vmax.f32 %v883_v23, 0.0  ;;  %v2690_v38 = vmul.f32 0.16666667, %v894_v30  ;;  %v884_v4 = vmax.f32 %v880_v32, 0.0  ;;  %1177 = vmatpush.msra.mxu2 %v1157_v14  ;;  %v1153_v32 = vld [vmem:[%s2872_s10 + $0xa0] sm:$0xff] }
 0x172   : > { %v889_v10 = vmin.f32 %v885_v34, 6.0  ;;  %1092 = vmatpush.msra.mxu0 %v1072_v31  ;;  %v1154_v34 = vld [vmem:[%s2872_s10 + $0xa8] sm:$0xff]  ;;  %v1155_v31 = vld [vmem:[%s2872_s10 + $0xb0] sm:$0xff]  ;;  %v1296_v14 = vld [vmem:[#allocation10 + $0x140] sm:$0xff] }
 0x173   : > { %v912_v37 = vrot.slane %v2690_v38, 4  ;;  %v891_v41 = vmin.f32 %v887_v58, 6.0  ;;  %v888_v5 = vmin.f32 %v884_v4, 6.0  ;;  %1178 = vmatpush.msra.mxu2 %v1153_v32  ;;  %v1156_v58 = vld [vmem:[%s2872_s10 + $0xb8] sm:$0xff]  ;;  %v1149_v4 = vld [vmem:[%s2872_s10 + $0x80] sm:$0xff] }
 0x174   : > { %v893_v29 = vmul.f32 %v889_v10, %v877_v24  ;;  %1093 = vmatpush.msra.mxu0 %v1071_v42  ;;  %v1164_v24 = vld [vmem:[%s2872_s10 + $0xf8] sm:$0xff]  ;;  %v1150_v10 = vld [vmem:[%s2872_s10 + $0x88] sm:$0xff]  ;;  %v1104_v32 = vld [vmem:[%s2871_s9] sm:$0x1] }
 0x175   : > { %v913_v40 = vadd.f32 %v912_v37, %v2690_v38  ;;  %v895_v45 = vmul.f32 %v891_v41, %v879_v18  ;;  %v892_v46 = vmul.f32 %v888_v5, %v876_v25  ;;  %v1158_v25 = vld [vmem:[%s2872_s10 + $0xc8] sm:$0xff]  ;;  %v1159_v18 = vld [vmem:[%s2872_s10 + $0xd0] sm:$0xff]  ;;  %1179 = vmatpush.msra.mxu2 %v1149_v4  ;;  %v1152_v41 = vld [vmem:[%s2872_s10 + $0x98] sm:$0xff] }
 0x176   : > { %v2694_v13 = vmul.f32 0.16666667, %v893_v29  ;;  %1094 = vmatpush.msra.mxu0 %v1070_v43  ;;  %1197 = vmatpush.msra.mxu3 %v1158_v25  ;;  %v1151_v37 = vld [vmem:[%s2872_s10 + $0x90] sm:$0xff]  ;;  %v1145_v5 = vld [vmem:[%s2872_s10 + $0x60] sm:$0xff]  ;;  %v1146_v29 = vld [vmem:[%s2872_s10 + $0x68] sm:$0xff] }
 0x177   : > { %v914_v19 = vrot.slane %v913_v40, 2  ;;  %v2696_v6 = vmul.f32 0.16666667, %v895_v45  ;;  %v2698_v48 = vmul.f32 0.16666667, %v892_v46  ;;  %1180 = vmatpush.msra.mxu2 %v1145_v5  ;;  %v1148_v45 = vld [vmem:[%s2872_s10 + $0x78] sm:$0xff] }
 0x178   : > { %v906_v50 = vrot.slane %v2694_v13, 4  ;;  %1095 = vmatpush.msra.mxu0 %v1069_v15  ;;  %1198 = vmatpush.msra.mxu3 %v1154_v34  ;;  %v1141_v46 = vld [vmem:[%s2872_s10 + $0x40] sm:$0xff]  ;;  %v1294_v34 = vld [vmem:[#allocation10 + $0x130] sm:$0xff] }
 0x179   : > { %v915_v27 = vadd.f32 %v914_v19, %v913_v40  ;;  %v918_v44 = vrot.slane %v2696_v6, 4  ;;  %v900_v63 = vrot.slane %v2698_v48, 4  ;;  %v1147_v40 = vld [vmem:[%s2872_s10 + $0x70] sm:$0xff]  ;;  %v1142_v19 = vld [vmem:[%s2872_s10 + $0x48] sm:$0xff]  ;;  %1181 = vmatpush.msra.mxu2 %v1141_v46  ;;  %v1300_v43 = vld [vmem:[#allocation10 + $0x160] sm:$0xff] }
 0x17a   : > { %v907_v51 = vadd.f32 %v906_v50, %v2694_v13  ;;  %1096 = vmatpush.msra.mxu0 %v1068_v16  ;;  %1199 = vmatpush.msra.mxu3 %v1150_v10  ;;  %v1143_v50 = vld [vmem:[%s2872_s10 + $0x50] sm:$0xff]  ;;  %v1285_v42 = vld [vmem:[#allocation10 + $0xe8] sm:$0xff]  ;;  %v1316_v15 = vld [vmem:[#allocation10 + $0x1e0] sm:$0xff] }
 0x17b   : > { %v916_v52 = vrot.slane %v915_v27, 1  ;;  %v919_v53 = vadd.f32 %v918_v44, %v2696_v6  ;;  %v901_v12 = vadd.f32 %v900_v63, %v2698_v48  ;;  %v1137_v44 = vld [vmem:[%s2872_s10 + $0x20] sm:$0xff]  ;;  %v1138_v63 = vld [vmem:[%s2872_s10 + $0x28] sm:$0xff]  ;;  %v1291_v46 = vld [vmem:[#allocation10 + $0x118] sm:$0xff] }
 0x17c   : > { %v908_v54 = vrot.slane %v907_v51, 2  ;;  %1200 = vmatpush.msra.mxu3 %v1146_v29  ;;  %1182 = vmatpush.msra.mxu2 %v1137_v44  ;;  %v1268_v16 = vld [vmem:[#allocation10 + $0x60] sm:$0xff]  ;;  %v1313_v33 = vld [vmem:[#allocation10 + $0x1c8] sm:$0xff]  ;;  %v1278_v4 = vld [vmem:[#allocation10 + $0xb0] sm:$0xff] }
 0x17d   : > { %v917_v7 = vadd.f32 %v916_v52, %v915_v27  ;;  %v920_v61 = vrot.slane %v919_v53, 2  ;;  %v902_v62 = vrot.slane %v901_v12, 2  ;;  %v1144_v27 = vld [vmem:[%s2872_s10 + $0x58] sm:$0xff] }
 0x17e   : > { %v909_v59 = vadd.f32 %v908_v54, %v907_v51  ;;  %1201 = vmatpush.msra.mxu3 %v1142_v19  ;;  %v1139_v51 = vld [vmem:[%s2872_s10 + $0x30] sm:$0xff]  ;;  %v1140_v52 = vld [vmem:[%s2872_s10 + $0x38] sm:$0xff] }
 0x17f   : > { %1044 = vmatmul.f32.vlgmr.msrb.gmra.mxu2 %v917_v7  ;;  %v921_v39 = vadd.f32 %v920_v61, %v919_v53  ;;  %v903_v55 = vadd.f32 %v902_v62, %v901_v12  ;;  %v1133_v53 = vld [vmem:[%s2872_s10] sm:$0xff]  ;;  %v1134_v12 = vld [vmem:[%s2872_s10 + $0x8] sm:$0xff]  ;;  %v1135_v54 = vld [vmem:[%s2872_s10 + $0x10] sm:$0xff] }
 0x180   : > { %v910_v28 = vrot.slane %v909_v59, 1  ;;  %1202 = vmatpush.msra.mxu3 %v1138_v63  ;;  %v1136_v7 = vld [vmem:[%s2872_s10 + $0x18] sm:$0xff]  ;;  %1183 = vmatpush.msra.mxu2 %v1133_v53  ;;  %v1261_v63 = vld [vmem:[#allocation10 + $0x28] sm:$0xff]  ;;  %v1306_v53 = vld [vmem:[#allocation10 + $0x190] sm:$0xff] }
 0x181   : > { %v922_v47 = vrot.slane %v921_v39, 1  ;;  %v904_v8 = vrot.slane %v903_v55, 1  ;;  %v1303_v61 = vld [vmem:[#allocation10 + $0x178] sm:$0xff]  ;;  %v1312_v25 = vld [vmem:[#allocation10 + $0x1c0] sm:$0xff] }
 0x182   : > { %v911_v1 = vadd.f32 %v910_v28, %v909_v59  ;;  %v1319_v62 = vld [vmem:[#allocation10 + $0x1f8] sm:$0xff]  ;;  %1203 = vmatpush.msra.mxu3 %v1134_v12  ;;  %v1302_v59 = vld [vmem:[#allocation10 + $0x170] sm:$0xff]  ;;  %v1292_v29 = vld [vmem:[#allocation10 + $0x120] sm:$0xff] }
 0x183   : > { %v923_v20 = vadd.f32 %v922_v47, %v921_v39  ;;  %v905_v9 = vadd.f32 %v904_v8, %v903_v55  ;;  %v1318_v39 = vld [vmem:[#allocation10 + $0x1f0] sm:$0xff]  ;;  %v1271_v55 = vld [vmem:[#allocation10 + $0x78] sm:$0xff]  ;;  %v1260_v12 = vld [vmem:[#allocation10 + $0x20] sm:$0xff] }
 0x184   : > { %1024 = vmatmul.f32.vlgmr.msrb.gmra.mxu1 %v911_v1  ;;  %v1287_v28 = vld [vmem:[#allocation10 + $0xf8] sm:$0xff]  ;;  %v1270_v47 = vld [vmem:[#allocation10 + $0x70] sm:$0xff]  ;;  %v1301_v1 = vld [vmem:[#allocation10 + $0x168] sm:$0xff]  ;;  %1324 = vmatpush.msrb.mxu2 %v1271_v55 }
 0x185   : > { %1064 = vmatmul.f32.vlgmr.msrb.gmra.mxu3 %v923_v20  ;;  %1004 = vmatmul.f32.vlgmr.msrb.gmra.mxu0 %v905_v9  ;;  %v1286_v8 = vld [vmem:[#allocation10 + $0xf0] sm:$0xff]  ;;  %v1317_v20 = vld [vmem:[#allocation10 + $0x1e8] sm:$0xff]  ;;  %v1307_v19 = vld [vmem:[#allocation10 + $0x198] sm:$0xff] }
 0x186   : > { %1216 = vmatpush.msrb.mxu1 %v1163_v17  ;;  %1236 = vmatpush.msrb.mxu0 %v1164_v24  ;;  %v1269_v9 = vld [vmem:[#allocation10 + $0x68] sm:$0xff]  ;;  %v1304_v55 = vld [vmem:[#allocation10 + $0x180] sm:$0xff] }
 0x187   : > { %1344 = vmatpush.msrb.mxu3 %v1287_v28  ;;  %1325 = vmatpush.msrb.mxu2 %v1270_v47  ;;  %v1265_v17 = vld [vmem:[#allocation10 + $0x48] sm:$0xff]  ;;  %v1258_v28 = vld [vmem:[#allocation10 + $0x10] sm:$0xff] }
 0x188   : > { %1217 = vmatpush.msrb.mxu1 %v1159_v18  ;;  %1237 = vmatpush.msrb.mxu0 %v1160_v49  ;;  %v1281_v24 = vld [vmem:[#allocation10 + $0xc8] sm:$0xff]  ;;  %v1264_v18 = vld [vmem:[#allocation10 + $0x40] sm:$0xff]  ;;  %v1274_v47 = vld [vmem:[#allocation10 + $0x90] sm:$0xff] }
 0x189   : > { %1345 = vmatpush.msrb.mxu3 %v1286_v8  ;;  %1326 = vmatpush.msrb.mxu2 %v1269_v9  ;;  %v1280_v49 = vld [vmem:[#allocation10 + $0xc0] sm:$0xff]  ;;  %v1257_v8 = vld [vmem:[#allocation10 + $0x8] sm:$0xff] }
 0x18a   : > { %1218 = vmatpush.msrb.mxu1 %v1155_v31  ;;  %1238 = vmatpush.msrb.mxu0 %v1156_v58  ;;  %v1310_v31 = vld [vmem:[#allocation10 + $0x1b0] sm:$0xff]  ;;  %v1272_v9 = vld [vmem:[#allocation10 + $0x80] sm:$0xff] }
 0x18b   : > { %1346 = vmatpush.msrb.mxu3 %v1285_v42  ;;  %1327 = vmatpush.msrb.mxu2 %v1268_v16  ;;  %v1262_v58 = vld [vmem:[#allocation10 + $0x30] sm:$0xff] }
 0x18c   : > { %1219 = vmatpush.msrb.mxu1 %v1151_v37  ;;  %1239 = vmatpush.msrb.mxu0 %v1152_v41  ;;  %v1293_v37 = vld [vmem:[#allocation10 + $0x128] sm:$0xff] }
 0x18d   : > { %1347 = vmatpush.msrb.mxu3 %v1284_v11  ;;  %v1309_v41 = vld [vmem:[#allocation10 + $0x1a8] sm:$0xff] }
 0x18e   : > { %1220 = vmatpush.msrb.mxu1 %v1147_v40  ;;  %1240 = vmatpush.msrb.mxu0 %v1148_v45  ;;  %v1308_v40 = vld [vmem:[#allocation10 + $0x1a0] sm:$0xff] }
 0x190   : > { %1221 = vmatpush.msrb.mxu1 %v1143_v50  ;;  %1241 = vmatpush.msrb.mxu0 %v1144_v27 }
 0x192   : > { %1222 = vmatpush.msrb.mxu1 %v1139_v51  ;;  %1242 = vmatpush.msrb.mxu0 %v1140_v52  ;;  %v1277_v51 = vld [vmem:[#allocation10 + $0xa8] sm:$0xff]  ;;  %v1290_v52 = vld [vmem:[#allocation10 + $0x110] sm:$0xff] }
 0x194   : > { %1223 = vmatpush.msrb.mxu1 %v1135_v54  ;;  %1243 = vmatpush.msrb.mxu0 %v1136_v7  ;;  %v1276_v54 = vld [vmem:[#allocation10 + $0xa0] sm:$0xff]  ;;  %v1289_v7 = vld [vmem:[#allocation10 + $0x108] sm:$0xff] }
 0x201   : > { %v1025_v21 = vpop.f32.mrf.mxu1 }
 0x202   : > { %v1005_v56 = vpop.f32.mrf.mxu0  ;;  %v1045_v22 = vpop.f32.mrf.mxu2 }
 0x203   : > { %v1026_v2 = vadd.f32 %v1025_v21, %v1005_v56  ;;  %v1299_v21 = vld [vmem:[#allocation10 + $0x158] sm:$0xff] }
 0x204   : > { %v1315_v56 = vld [vmem:[#allocation10 + $0x1d8] sm:$0xff] }
 0x205   : > { %v1046_v57 = vadd.f32 %v1045_v22, %v1026_v2  ;;  %v1267_v2 = vld [vmem:[#allocation10 + $0x58] sm:$0xff] }
 0x206   : > { %v1283_v22 = vld [vmem:[#allocation10 + $0xd8] sm:$0xff]  ;;  %1328 = vmatpush.msrb.mxu2 %v1267_v2 }
 0x207   : > { %1348 = vmatpush.msrb.mxu3 %v1283_v22 }
 0x208   : > { %v1065_v26 = vpop.f32.mrf.mxu3 }
 0x209   : > { %v1066_v3 = vadd.f32 %v1065_v26, %v1046_v57  ;;  %v1298_v57 = vld [vmem:[#allocation10 + $0x150] sm:$0xff]  ;;  %1349 = vmatpush.msrb.mxu3 %v1282_v60  ;;  %v1654_v60 = vld [vmem:[%s2874_s12] ss:$0 sm:$0xff] }
 0x20a   : > { %v1314_v26 = vld [vmem:[#allocation10 + $0x1d0] sm:$0xff] }
 0x20b   : > { %1547 = vmatmul.msk.f32.vlgmr.msra.gmra.mxu0 %vm1077_vm5, %v1066_v3  ;;  %v1266_v3 = vld [vmem:[#allocation10 + $0x50] sm:$0xff]  ;;  %1350 = vmatpush.msrb.mxu3 %v1281_v24 }
 0x20c   : > { %1384 = vmatpush.msra.mxu0 %v1319_v62  ;;  %1329 = vmatpush.msrb.mxu2 %v1266_v3  ;;  %v1259_v62 = vld [vmem:[#allocation10 + $0x18] sm:$0xff] }
 0x20d   : > { %1351 = vmatpush.msrb.mxu3 %v1280_v49 }
 0x20e   : > { %1385 = vmatpush.msra.mxu0 %v1318_v39  ;;  %1330 = vmatpush.msrb.mxu2 %v1265_v17  ;;  %v1288_v39 = vld [vmem:[#allocation10 + $0x100] sm:$0xff] }
 0x210   : > { %1386 = vmatpush.msra.mxu0 %v1317_v20  ;;  %1331 = vmatpush.msrb.mxu2 %v1264_v18  ;;  %v1256_v20 = vld [vmem:[#allocation10] sm:$0xff] }
 0x212   : > { %1387 = vmatpush.msra.mxu0 %v1316_v15 }
 0x214   : > { %1388 = vmatpush.msra.mxu0 %v1315_v56 }
 0x216   : > { %1389 = vmatpush.msra.mxu0 %v1314_v26 }
 0x218   : > { %1390 = vmatpush.msra.mxu0 %v1313_v33 }
 0x21a   : > { %1391 = vmatpush.msra.mxu0 %v1312_v25 }
 0x288   : > { %v1098_v36 = vpop.f32.mrf.mxu0 }
 0x289   : > { %v1099_v23 = vadd.f32 %v1098_v36, %v1076_v0  ;;  %v1295_v0 = vld [vmem:[#allocation10 + $0x138] sm:$0xff] }
 0x28a   : > { %v1311_v36 = vld [vmem:[#allocation10 + $0x1b8] sm:$0xff] }
 0x28b   : > { %v1101_v30 = vmax.f32 %v1099_v23, 0.0  ;;  %v1263_v23 = vld [vmem:[#allocation10 + $0x38] sm:$0xff]  ;;  %1392 = vmatpush.msra.mxu0 %v1311_v36 }
 0x28c   : > { %1332 = vmatpush.msrb.mxu2 %v1263_v23 }
 0x28d   : > { %1548 = vmatmul.msk.f32.vlgmr.msra.gmra.mxu1 %vm1105_vm6, %v1101_v30  ;;  %v1279_v30 = vld [vmem:[#allocation10 + $0xb8] sm:$0xff]  ;;  %1393 = vmatpush.msra.mxu0 %v1310_v31 }
 0x28e   : > { %1364 = vmatpush.msra.mxu1 %v1303_v61  ;;  %1352 = vmatpush.msrb.mxu3 %v1279_v30  ;;  %v1305_v61 = vld [vmem:[#allocation10 + $0x188] sm:$0xff] }
 0x28f   : > { %1333 = vmatpush.msrb.mxu2 %v1262_v58  ;;  %1394 = vmatpush.msra.mxu0 %v1309_v41 }
 0x290   : > { %1365 = vmatpush.msra.mxu1 %v1302_v59  ;;  %1353 = vmatpush.msrb.mxu3 %v1278_v4  ;;  %v1275_v59 = vld [vmem:[#allocation10 + $0x98] sm:$0xff] }
 0x291   : > { %1395 = vmatpush.msra.mxu0 %v1308_v40  ;;  %1334 = vmatpush.msrb.mxu2 %v1261_v63 }
 0x292   : > { %1366 = vmatpush.msra.mxu1 %v1301_v1  ;;  %1354 = vmatpush.msrb.mxu3 %v1277_v51  ;;  %v1273_v1 = vld [vmem:[#allocation10 + $0x88] sm:$0xff] }
 0x293   : > { %1396 = vmatpush.msra.mxu0 %v1307_v19  ;;  %1335 = vmatpush.msrb.mxu2 %v1260_v12 }
 0x294   : > { %1367 = vmatpush.msra.mxu1 %v1300_v43  ;;  %1355 = vmatpush.msrb.mxu3 %v1276_v54 }
 0x295   : > { %1397 = vmatpush.msra.mxu0 %v1306_v53  ;;  %1336 = vmatpush.msrb.mxu2 %v1259_v62 }
 0x296   : > { %1368 = vmatpush.msra.mxu1 %v1299_v21  ;;  %1356 = vmatpush.msrb.mxu3 %v1275_v59 }
 0x297   : > { %1398 = vmatpush.msra.mxu0 %v1305_v61  ;;  %1337 = vmatpush.msrb.mxu2 %v1258_v28 }
 0x298   : > { %1369 = vmatpush.msra.mxu1 %v1298_v57  ;;  %1357 = vmatpush.msrb.mxu3 %v1274_v47 }
 0x299   : > { %1399 = vmatpush.msra.mxu0 %v1304_v55  ;;  %1338 = vmatpush.msrb.mxu2 %v1257_v8 }
 0x29a   : > { %1370 = vmatpush.msra.mxu1 %v1297_v35  ;;  %1358 = vmatpush.msrb.mxu3 %v1273_v1 }
 0x29b   : > { %1339 = vmatpush.msrb.mxu2 %v1256_v20 }
 0x29c   : > { %1371 = vmatpush.msra.mxu1 %v1296_v14  ;;  %1359 = vmatpush.msrb.mxu3 %v1272_v9  ;;  %v1655_v14 = vld [vmem:[%s2238_s15] sm:$0xff] }
 0x29e   : > { %1372 = vmatpush.msra.mxu1 %v1295_v0 }
 0x2a0   : > { %1373 = vmatpush.msra.mxu1 %v1294_v34 }
 0x2a2   : > { %1374 = vmatpush.msra.mxu1 %v1293_v37 }
 0x2a4   : > { %1375 = vmatpush.msra.mxu1 %v1292_v29 }
 0x2a6   : > { %1376 = vmatpush.msra.mxu1 %v1291_v46 }
 0x2a8   : > { %1377 = vmatpush.msra.mxu1 %v1290_v52 }
 0x2aa   : > { %1378 = vmatpush.msra.mxu1 %v1289_v7 }
 0x2ac   : > { %1379 = vmatpush.msra.mxu1 %v1288_v39 }
 0x30a   : > { %v1126_v10 = vpop.f32.mrf.mxu1 }
 0x30b   : > { %v1127_v5 = vadd.f32 %v1126_v10, %v1104_v32 }
 0x30d   : > { %v1129_v45 = vadd.f32 3.0, %v1127_v5 }
 0x30f   : > { %v1130_v50 = vmax.f32 %v1129_v45, 0.0 }
 0x311   : > { %v1131_v27 = vmin.f32 %v1130_v50, 6.0 }
 0x313   : > { %v1132_v44 = vmul.f32 0.16666667, %v1131_v27 }
 0x315   : > { %1549 = vmatmul.msk.f32.vlgmr.msra.gmra.mxu2 %vm1077_vm5, %v1132_v44  ;;  %1550 = vmatmul.msk.f32.vlgmr.msra.gmra.mxu3 %vm1077_vm5, %v1132_v44 }
 0x316   : > { %1551 = vmatmul.msk.f32.vlgmr.msrb.gmra.mxu1 %vm1077_vm5, %v1132_v44  ;;  %1552 = vmatmul.msk.f32.vlgmr.msrb.gmra.mxu0 %vm1077_vm5, %v1132_v44 }
 0x393   : > { %v1225_v42 = vpop.f32.mrf.mxu1  ;;  %v1245_v43 = vpop.f32.mrf.mxu0 }
 0x394   : > { %v1250_v15 = vperm.slane %v1225_v42, 0  ;;  %v1251_v16 = vperm.slane %v1245_v43, 0 }
 0x396   : > { %v1254_v11 = vmul.f32 %v1250_v15, %v2690_v38  ;;  %v1255_v21 = vmul.f32 %v1251_v16, %v2696_v6 }
 0x398   : > { %1380 = vmatmul.f32.vlgmr.msra.gmra.mxu1 %v1254_v11  ;;  %1400 = vmatmul.f32.vlgmr.msra.gmra.mxu0 %v1255_v21  ;;  %v1185_v56 = vpop.f32.mrf.mxu2  ;;  %v1205_v2 = vpop.f32.mrf.mxu3 }
 0x399   : > { %v1248_v22 = vperm.slane %v1185_v56, 0  ;;  %v1249_v57 = vperm.slane %v1205_v2, 0 }
 0x39b   : > { %v1252_v26 = vmul.f32 %v1248_v22, %v2698_v48  ;;  %v1253_v3 = vmul.f32 %v1249_v57, %v2694_v13 }
 0x39d   : > { %1340 = vmatmul.f32.vlgmr.msrb.gmra.mxu2 %v1252_v26  ;;  %1360 = vmatmul.f32.vlgmr.msrb.gmra.mxu3 %v1253_v3 }
 0x415   : > { %v1381_v48 = vpop.f32.mrf.mxu1  ;;  %v1401_v17 = vpop.f32.mrf.mxu0 }
 0x420   : > { %v1341_v38 = vpop.f32.mrf.mxu2  ;;  %v1361_v35 = vpop.f32.mrf.mxu3 }
 0x421   : > { %v1342_v6 = vadd.f32 %v1654_v60, %v1341_v38 }
 0x423   : > { %v1362_v33 = vadd.f32 %v1361_v35, %v1342_v6 }
 0x425   : > { %v1382_v13 = vadd.f32 %v1381_v48, %v1362_v33 }
 0x427   : > { %v1402_v24 = vadd.f32 %v1401_v17, %v1382_v13 }
 0x429   : > { %v1404_v25 = vadd.f32 %v1655_v14, %v1402_v24 }
 0x42b   : > { %1405 = vst [vmem:[%s508_s21] sm:$0xff] %v1404_v25 }
 0x42c   : > { %1833 = shalt.err (!%p1830_p8)
}
 0x42d   : > { %1577 = dma.vmem_to_hbm [thread:$0]  (%p1998_p5), %s1420_s23, 128, %s1422_s17, %s1407_s29  }
 0x42e PF: > { %s2904_s15 = sld [smem:[#allocation18_spill]] }
 0x42f   : > { %s2905_s18 = sld [smem:[#allocation16_spill]] }
 0x434   : > { %p1609_p9 = scmp.ge.s32.totalorder %s2904_s15, 2 }
 0x435   : > { %s1433_s20 = sand.u32 1, %s2905_s18  }
 0x436   : > { %p1596_p10 = pnand %p1609_p9, %p2002_p6  ;;  %s1434_s30 = scalar_lea.sflag [#allocation4], %s1433_s20 }
 0x438   : > { %p1597_p11 = pneg %p1596_p10 }
 0x43a   : > { %1863 = dma.done.wait (%p1597_p11), %s1434_s30, 128  }
 0x43b   : > { %1865 = vsyncadd (%p1597_p11), %s1434_s30, 4294967168  ;;  %s2907_s28 = sld [smem:[#allocation19_spill]]  ;;  %s2910_s25 = smov %s1872_s26 }
 0x43c   : > { %s2908_s24 = sld [smem:[#allocation17_spill]] }
 0x43d   : > { %s2909_s27 = sld [smem:[#allocation20_spill]] }
 0x441   : > { %p26_p12 = scmp.ge.s32.totalorder %s2907_s28, 4  }
 0x442   : > { %s2911_s26 = smov %s2908_s24 }
 0x443   :  { %28 = sbr.rel (!%p26_p12) target bundleno = 9 (0x9), region = 128 }
 0x448   :  { %1440 = vsyncpa [#allocation3], 1 }
 0x449   :  { %1442 = vsyncpa [#allocation3 + $0x1], 1 }
 0x44a   :  { %1443 = vsyncpa [#allocation6], 1 }
 0x44b   :  { %1444 = vsyncpa [#allocation9], 1 }
 0x44c   :  { %1445 = vsyncpa [#allocation4], 1 }
 0x44d   :  { %1447 = vsyncpa [#allocation4 + $0x1], 1 }

</bundles_post_ra>
